<compile_context>
chip_gen: v5e
topology: v5e:2x2
jax: 0.10.0
libtpu: 0.0.40
codegen_flags: <defaults>
</compile_context>

<pallas_src>
import functools

import jax
import jax.numpy as jnp
from jax.experimental import pallas as pl
from jax.experimental.pallas import tpu as pltpu

EMBED_DIM = 128               # Embedding(word_types, 128)
SEQ = 6                       # .view(-1, 768)  =>  6 tokens * 128 dims
HIDDEN_IN = SEQ * EMBED_DIM   # 768
HIDDEN = 128                  # fc1 output width


def _round_up(n, m):
    return ((n + m - 1) // m) * m


def _choose_block_batch(batch, *, max_tile=512, min_tiles=2):
    """Adaptive batch tile: >=2 grid steps (v7x megacore), tiles <= max_tile,
    rounded to the 8-row sublane so padding waste stays minimal."""
    if batch <= 8:
        return 8
    n_tiles = max(min_tiles, -(-batch // max_tile))
    return _round_up(-(-batch // n_tiles), 8)


def _fused_kernel(ids_ref, m_ref, b1_ref, w2_ref, b2_ref, o_ref):
    """One batch tile of: logits = relu(sum_s onehot(ids_s) @ M[s] + b1) @ W2 + b2.

    ids_ref: (bm, SEQ)                 int32  token ids
    m_ref  : (SEQ, vocab_pad, 128)     bf16   folded table  M[s] = tab @ W1[s]
    b1_ref : (1, 128)                  f32
    w2_ref : (128, out_pad)            bf16   fc2 weight, (in, out), zero-padded cols
    b2_ref : (1, out_pad)              f32
    o_ref  : (bm, out_pad)             f32
    """
    bm = ids_ref.shape[0]
    vocab_pad = m_ref.shape[1]

    ids = ids_ref[...]                                              # (bm, SEQ)
    lane_ids = jax.lax.broadcasted_iota(jnp.int32, (bm, vocab_pad), 1)

    acc = jnp.zeros((bm, HIDDEN), jnp.float32)
    for s in range(SEQ):                                            # static unroll
        # Gather-as-matmul against the fc1-folded table: one-hot rows pick the
        # exact bf16 folded rows, accumulated in f32 on the MXU.
        one_hot = (ids[:, s:s + 1] == lane_ids).astype(m_ref.dtype)  # (bm, vocab_pad)
        acc = acc + jnp.dot(one_hot, m_ref[s],
                            preferred_element_type=jnp.float32)      # (bm, 128)

    h = jnp.maximum(acc + b1_ref[...], 0.0)                          # ReLU, f32
    logits = jnp.dot(h.astype(w2_ref.dtype), w2_ref[...],
                     preferred_element_type=jnp.float32) + b2_ref[...]
    o_ref[...] = logits.astype(o_ref.dtype)


def prepare_params(embed_table, w1, b1, w2, b2, *, param_dtype=jnp.bfloat16):
    """One-time parameter prep (run once, NOT per forward call):
    fold fc1 into the embedding table, pad to lane/sublane-friendly shapes,
    cast matmul operands to bf16 (fold done in f32 first)."""
    vocab, edim = embed_table.shape
    assert edim == EMBED_DIM
    assert w1.shape == (HIDDEN_IN, HIDDEN)
    outputs = w2.shape[1]

    vocab_pad = _round_up(vocab, 128)     # lane-aligned one-hot / MXU K dim
    out_pad = _round_up(outputs, 128)     # lane-dense output stores

    # Fold fc1 into the table per token slot: M[s] = tab @ W1[s]  (f32, then bf16).
    w1_r = w1.astype(jnp.float32).reshape(SEQ, EMBED_DIM, HIDDEN)
    m_fold_f32 = jnp.einsum('ve,seh->svh', embed_table.astype(jnp.float32), w1_r)
    m_fold = jnp.zeros((SEQ, vocab_pad, HIDDEN), param_dtype).at[:, :vocab, :].set(
        m_fold_f32.astype(param_dtype))

    b1_2d = b1.astype(jnp.float32).reshape(1, HIDDEN)
    w2_p = jnp.zeros((HIDDEN, out_pad), param_dtype).at[:, :outputs].set(
        w2.astype(param_dtype))
    b2_p = jnp.zeros((1, out_pad), jnp.float32).at[:, :outputs].set(
        b2.astype(jnp.float32).reshape(1, outputs))

    # NOTE: the folded table is VMEM-resident (SEQ * vocab_pad * 128 * 2B,
    # double-buffered). Fine up to a few thousand word types; for large
    # vocabularies switch to a scalar-prefetched DMA row gather with the table
    # kept in HBM (memory_space=pl.ANY).
    return m_fold, b1_2d, w2_p, b2_p


@functools.partial(jax.jit, static_argnames=("num_outputs", "block_batch"))
def dependency_model_forward(inputs, m_fold, b1_2d, w2_p, b2_p,
                             *, num_outputs, block_batch=None):
    """Forward pass matching DependencyModel.forward.

    inputs : int (B, SEQ) token indices
    m_fold, b1_2d, w2_p, b2_p : outputs of prepare_params
    returns: f32 (B, num_outputs) logits
    """
    B, seq = inputs.shape
    assert seq == SEQ, f"expected {SEQ} tokens per example (768 = 6 * 128)"
    _, vocab_pad, _ = m_fold.shape
    out_pad = w2_p.shape[1]

    if block_batch is None:
        block_batch = _choose_block_batch(B)
    b_pad = _round_up(max(B, 1), block_batch)

    if b_pad != B:
        ids = jnp.zeros((b_pad, SEQ), jnp.int32).at[:B].set(inputs.astype(jnp.int32))
    else:
        ids = inputs.astype(jnp.int32)

    grid = (b_pad // block_batch,)

    flops = 2 * b_pad * SEQ * vocab_pad * HIDDEN + 2 * b_pad * HIDDEN * out_pad
    bytes_accessed = (b_pad * SEQ * 4
                      + m_fold.size * m_fold.dtype.itemsize
                      + w2_p.size * w2_p.dtype.itemsize
                      + b1_2d.size * 4 + b2_p.size * 4
                      + b_pad * out_pad * 4)

    out = pl.pallas_call(
        _fused_kernel,
        out_shape=jax.ShapeDtypeStruct((b_pad, out_pad), jnp.float32),
        grid_spec=pltpu.PrefetchScalarGridSpec(
            num_scalar_prefetch=0,
            grid=grid,
            in_specs=[
                pl.BlockSpec((block_batch, SEQ), lambda i: (i, 0)),            # ids tile
                pl.BlockSpec((SEQ, vocab_pad, HIDDEN), lambda i: (0, 0, 0)),   # folded table
                pl.BlockSpec((1, HIDDEN), lambda i: (0, 0)),                   # b1
                pl.BlockSpec((HIDDEN, out_pad), lambda i: (0, 0)),             # w2
                pl.BlockSpec((1, out_pad), lambda i: (0, 0)),                  # b2
            ],
            out_specs=pl.BlockSpec((block_batch, out_pad), lambda i: (i, 0)),
        ),
        compiler_params=pltpu.CompilerParams(
            dimension_semantics=("parallel",),   # batch tiles shard across TCs (v7x)
        ),
        cost_estimate=pl.CostEstimate(flops=flops, transcendentals=0,
                                      bytes_accessed=bytes_accessed),
    )(ids, m_fold, b1_2d, w2_p, b2_p)

    # Callers that can consume the padded (b_pad, out_pad) buffer directly
    # should do so to avoid this extra slice copy.
    return out[:B, :num_outputs]


def reference_forward(inputs, embed_table, w1, b1, w2, b2):
    """Pure-JAX reference identical to the PyTorch forward (f32)."""
    x = jnp.take(embed_table, inputs, axis=0).reshape(inputs.shape[0], HIDDEN_IN)
    h = jnp.maximum(x @ w1 + b1, 0.0)
    return h @ w2 + b2


if __name__ == "__main__":
    word_types = 100
    outputs = 64
    batch = 300          # non-multiple of the tile -> exercises padding; 2 grid steps

    key = jax.random.PRNGKey(0)
    k_emb, k_w1, k_b1, k_w2, k_b2, k_in = jax.random.split(key, 6)

    # Embedding ~ N(0,1) (PyTorch default); Linear ~ U(-1/sqrt(fan_in), 1/sqrt(fan_in)).
    embed_table = jax.random.normal(k_emb, (word_types, EMBED_DIM), dtype=jnp.float32)
    lim1 = 1.0 / jnp.sqrt(jnp.float32(HIDDEN_IN))
    w1 = jax.random.uniform(k_w1, (HIDDEN_IN, HIDDEN), jnp.float32, -lim1, lim1)
    b1 = jax.random.uniform(k_b1, (HIDDEN,), jnp.float32, -lim1, lim1)
    lim2 = 1.0 / jnp.sqrt(jnp.float32(HIDDEN))
    w2 = jax.random.uniform(k_w2, (HIDDEN, outputs), jnp.float32, -lim2, lim2)
    b2 = jax.random.uniform(k_b2, (outputs,), jnp.float32, -lim2, lim2)

    inputs = jax.random.randint(k_in, (batch, SEQ), 0, word_types, dtype=jnp.int32)

    # One-time param prep (fold fc1 into the table, pad, cast) -- off the hot path.
    m_fold, b1_2d, w2_p, b2_p = prepare_params(embed_table, w1, b1, w2, b2)

    logits = dependency_model_forward(inputs, m_fold, b1_2d, w2_p, b2_p,
                                      num_outputs=outputs)
    logits = jax.block_until_ready(logits)
    assert logits.shape == (batch, outputs)

    # Tight structural check: same math with the folded bf16 table the kernel sees.
    m_q = m_fold[:, :word_types, :].astype(jnp.float32)            # (SEQ, vocab, 128)
    acc_q = sum(m_q[s][inputs[:, s]] for s in range(SEQ))           # (batch, 128)
    h_q = jnp.maximum(acc_q + b1, 0.0)
    q = lambda a: a.astype(jnp.bfloat16).astype(jnp.float32)
    ref_q = q(h_q) @ q(w2) + b2
    err_q = float(jnp.max(jnp.abs(logits - ref_q)))
    assert jnp.allclose(logits, ref_q, atol=2e-2, rtol=2e-2), (
        f"mismatch vs folded-bf16 reference (max abs err {err_q})")

    # Looser semantic check against the full-f32 reference (original module math).
    ref = reference_forward(inputs, embed_table, w1, b1, w2, b2)
    err = float(jnp.max(jnp.abs(logits - ref)))
    assert jnp.allclose(logits, ref, atol=1e-1, rtol=1e-1), (
        f"mismatch vs f32 reference (max abs err {err})")

    print("KERNEL_OK")
</pallas_src>

<mosaic_0001>
module attributes {stable_mosaic.version = 11 : i64} {
  func.func @_fused_kernel(%arg0: i32, %arg1: memref<152x6xi32, #tpu.memory_space<vmem>>, %arg2: memref<6x128x128xbf16, #tpu.memory_space<vmem>>, %arg3: memref<1x128xf32, #tpu.memory_space<vmem>>, %arg4: memref<128x128xbf16, #tpu.memory_space<vmem>>, %arg5: memref<1x128xf32, #tpu.memory_space<vmem>>, %arg6: memref<152x128xf32, #tpu.memory_space<vmem>>) attributes {dimension_semantics = [#tpu.dimension_semantics<parallel>], iteration_bounds = array<i64: 2>, scalar_prefetch = 0 : i64, scratch_operands = 0 : i64, tpu.core_type = #tpu.core_type<tc>, window_params = [{transform_indices = @transform_0, window_bounds = array<i64: 152, 6>}, {pipeline_mode = #tpu.pipeline_mode<synchronous>, transform_indices = @transform_1, window_bounds = array<i64: 6, 128, 128>}, {pipeline_mode = #tpu.pipeline_mode<synchronous>, transform_indices = @transform_2, window_bounds = array<i64: 1, 128>}, {pipeline_mode = #tpu.pipeline_mode<synchronous>, transform_indices = @transform_3, window_bounds = array<i64: 128, 128>}, {pipeline_mode = #tpu.pipeline_mode<synchronous>, transform_indices = @transform_4, window_bounds = array<i64: 1, 128>}, {transform_indices = @transform_5, window_bounds = array<i64: 152, 128>}]} {
    %c0 = arith.constant 0 : index
    %c0_0 = arith.constant 0 : index
    %0 = vector.load %arg1[%c0, %c0_0] : memref<152x6xi32, #tpu.memory_space<vmem>>, vector<152x6xi32>
    %1 = tpu.iota {dimensions = array<i32: 1>} : vector<152x128xi32>
    %cst = arith.constant 0.000000e+00 : f32
    %2 = vector.broadcast %cst : f32 to vector<152x128xf32>
    %3 = vector.extract_strided_slice %0 {offsets = [0, 0], sizes = [152, 1], strides = [1, 1]} : vector<152x6xi32> to vector<152x1xi32>
    %4 = vector.broadcast %3 : vector<152x1xi32> to vector<152x128xi32>
    %5 = arith.cmpi eq, %4, %1 : vector<152x128xi32>
    %6 = arith.extui %5 : vector<152x128xi1> to vector<152x128xi32>
    %7 = arith.sitofp %6 : vector<152x128xi32> to vector<152x128xf32>
    %8 = arith.truncf %7 : vector<152x128xf32> to vector<152x128xbf16>
    %c0_1 = arith.constant 0 : index
    %c0_2 = arith.constant 0 : index
    %c0_3 = arith.constant 0 : index
    %9 = vector.load %arg2[%c0_1, %c0_2, %c0_3] : memref<6x128x128xbf16, #tpu.memory_space<vmem>>, vector<1x128x128xbf16>
    %10 = vector.shape_cast %9 : vector<1x128x128xbf16> to vector<128x128xbf16>
    %cst_4 = arith.constant dense<0.000000e+00> : vector<152x128xf32>
    %11 = tpu.matmul %8, %10, %cst_4 {dimension_numbers = #tpu.dot_dimension_numbers<[1], [0], [0], [1], [0, 0, 1, 1], [], []>} : vector<152x128xbf16>, vector<128x128xbf16>, vector<152x128xf32> -> vector<152x128xf32>
    %12 = arith.addf %2, %11 : vector<152x128xf32>
    %13 = vector.extract_strided_slice %0 {offsets = [0, 1], sizes = [152, 1], strides = [1, 1]} : vector<152x6xi32> to vector<152x1xi32>
    %14 = vector.broadcast %13 : vector<152x1xi32> to vector<152x128xi32>
    %15 = arith.cmpi eq, %14, %1 : vector<152x128xi32>
    %16 = arith.extui %15 : vector<152x128xi1> to vector<152x128xi32>
    %17 = arith.sitofp %16 : vector<152x128xi32> to vector<152x128xf32>
    %18 = arith.truncf %17 : vector<152x128xf32> to vector<152x128xbf16>
    %c1 = arith.constant 1 : index
    %c0_5 = arith.constant 0 : index
    %c0_6 = arith.constant 0 : index
    %19 = vector.load %arg2[%c1, %c0_5, %c0_6] : memref<6x128x128xbf16, #tpu.memory_space<vmem>>, vector<1x128x128xbf16>
    %20 = vector.shape_cast %19 : vector<1x128x128xbf16> to vector<128x128xbf16>
    %cst_7 = arith.constant dense<0.000000e+00> : vector<152x128xf32>
    %21 = tpu.matmul %18, %20, %cst_7 {dimension_numbers = #tpu.dot_dimension_numbers<[1], [0], [0], [1], [0, 0, 1, 1], [], []>} : vector<152x128xbf16>, vector<128x128xbf16>, vector<152x128xf32> -> vector<152x128xf32>
    %22 = arith.addf %12, %21 : vector<152x128xf32>
    %23 = vector.extract_strided_slice %0 {offsets = [0, 2], sizes = [152, 1], strides = [1, 1]} : vector<152x6xi32> to vector<152x1xi32>
    %24 = vector.broadcast %23 : vector<152x1xi32> to vector<152x128xi32>
    %25 = arith.cmpi eq, %24, %1 : vector<152x128xi32>
    %26 = arith.extui %25 : vector<152x128xi1> to vector<152x128xi32>
    %27 = arith.sitofp %26 : vector<152x128xi32> to vector<152x128xf32>
    %28 = arith.truncf %27 : vector<152x128xf32> to vector<152x128xbf16>
    %c2 = arith.constant 2 : index
    %c0_8 = arith.constant 0 : index
    %c0_9 = arith.constant 0 : index
    %29 = vector.load %arg2[%c2, %c0_8, %c0_9] : memref<6x128x128xbf16, #tpu.memory_space<vmem>>, vector<1x128x128xbf16>
    %30 = vector.shape_cast %29 : vector<1x128x128xbf16> to vector<128x128xbf16>
    %cst_10 = arith.constant dense<0.000000e+00> : vector<152x128xf32>
    %31 = tpu.matmul %28, %30, %cst_10 {dimension_numbers = #tpu.dot_dimension_numbers<[1], [0], [0], [1], [0, 0, 1, 1], [], []>} : vector<152x128xbf16>, vector<128x128xbf16>, vector<152x128xf32> -> vector<152x128xf32>
    %32 = arith.addf %22, %31 : vector<152x128xf32>
    %33 = vector.extract_strided_slice %0 {offsets = [0, 3], sizes = [152, 1], strides = [1, 1]} : vector<152x6xi32> to vector<152x1xi32>
    %34 = vector.broadcast %33 : vector<152x1xi32> to vector<152x128xi32>
    %35 = arith.cmpi eq, %34, %1 : vector<152x128xi32>
    %36 = arith.extui %35 : vector<152x128xi1> to vector<152x128xi32>
    %37 = arith.sitofp %36 : vector<152x128xi32> to vector<152x128xf32>
    %38 = arith.truncf %37 : vector<152x128xf32> to vector<152x128xbf16>
    %c3 = arith.constant 3 : index
    %c0_11 = arith.constant 0 : index
    %c0_12 = arith.constant 0 : index
    %39 = vector.load %arg2[%c3, %c0_11, %c0_12] : memref<6x128x128xbf16, #tpu.memory_space<vmem>>, vector<1x128x128xbf16>
    %40 = vector.shape_cast %39 : vector<1x128x128xbf16> to vector<128x128xbf16>
    %cst_13 = arith.constant dense<0.000000e+00> : vector<152x128xf32>
    %41 = tpu.matmul %38, %40, %cst_13 {dimension_numbers = #tpu.dot_dimension_numbers<[1], [0], [0], [1], [0, 0, 1, 1], [], []>} : vector<152x128xbf16>, vector<128x128xbf16>, vector<152x128xf32> -> vector<152x128xf32>
    %42 = arith.addf %32, %41 : vector<152x128xf32>
    %43 = vector.extract_strided_slice %0 {offsets = [0, 4], sizes = [152, 1], strides = [1, 1]} : vector<152x6xi32> to vector<152x1xi32>
    %44 = vector.broadcast %43 : vector<152x1xi32> to vector<152x128xi32>
    %45 = arith.cmpi eq, %44, %1 : vector<152x128xi32>
    %46 = arith.extui %45 : vector<152x128xi1> to vector<152x128xi32>
    %47 = arith.sitofp %46 : vector<152x128xi32> to vector<152x128xf32>
    %48 = arith.truncf %47 : vector<152x128xf32> to vector<152x128xbf16>
    %c4 = arith.constant 4 : index
    %c0_14 = arith.constant 0 : index
    %c0_15 = arith.constant 0 : index
    %49 = vector.load %arg2[%c4, %c0_14, %c0_15] : memref<6x128x128xbf16, #tpu.memory_space<vmem>>, vector<1x128x128xbf16>
    %50 = vector.shape_cast %49 : vector<1x128x128xbf16> to vector<128x128xbf16>
    %cst_16 = arith.constant dense<0.000000e+00> : vector<152x128xf32>
    %51 = tpu.matmul %48, %50, %cst_16 {dimension_numbers = #tpu.dot_dimension_numbers<[1], [0], [0], [1], [0, 0, 1, 1], [], []>} : vector<152x128xbf16>, vector<128x128xbf16>, vector<152x128xf32> -> vector<152x128xf32>
    %52 = arith.addf %42, %51 : vector<152x128xf32>
    %53 = vector.extract_strided_slice %0 {offsets = [0, 5], sizes = [152, 1], strides = [1, 1]} : vector<152x6xi32> to vector<152x1xi32>
    %54 = vector.broadcast %53 : vector<152x1xi32> to vector<152x128xi32>
    %55 = arith.cmpi eq, %54, %1 : vector<152x128xi32>
    %56 = arith.extui %55 : vector<152x128xi1> to vector<152x128xi32>
    %57 = arith.sitofp %56 : vector<152x128xi32> to vector<152x128xf32>
    %58 = arith.truncf %57 : vector<152x128xf32> to vector<152x128xbf16>
    %c5 = arith.constant 5 : index
    %c0_17 = arith.constant 0 : index
    %c0_18 = arith.constant 0 : index
    %59 = vector.load %arg2[%c5, %c0_17, %c0_18] : memref<6x128x128xbf16, #tpu.memory_space<vmem>>, vector<1x128x128xbf16>
    %60 = vector.shape_cast %59 : vector<1x128x128xbf16> to vector<128x128xbf16>
    %cst_19 = arith.constant dense<0.000000e+00> : vector<152x128xf32>
    %61 = tpu.matmul %58, %60, %cst_19 {dimension_numbers = #tpu.dot_dimension_numbers<[1], [0], [0], [1], [0, 0, 1, 1], [], []>} : vector<152x128xbf16>, vector<128x128xbf16>, vector<152x128xf32> -> vector<152x128xf32>
    %62 = arith.addf %52, %61 : vector<152x128xf32>
    %c0_20 = arith.constant 0 : index
    %c0_21 = arith.constant 0 : index
    %63 = vector.load %arg3[%c0_20, %c0_21] : memref<1x128xf32, #tpu.memory_space<vmem>>, vector<1x128xf32>
    %64 = vector.broadcast %63 : vector<1x128xf32> to vector<152x128xf32>
    %65 = arith.addf %62, %64 : vector<152x128xf32>
    %cst_22 = arith.constant 0.000000e+00 : f32
    %66 = vector.broadcast %cst_22 : f32 to vector<152x128xf32>
    %67 = arith.maximumf %65, %66 : vector<152x128xf32>
    %68 = arith.truncf %67 : vector<152x128xf32> to vector<152x128xbf16>
    %c0_23 = arith.constant 0 : index
    %c0_24 = arith.constant 0 : index
    %69 = vector.load %arg4[%c0_23, %c0_24] : memref<128x128xbf16, #tpu.memory_space<vmem>>, vector<128x128xbf16>
    %cst_25 = arith.constant dense<0.000000e+00> : vector<152x128xf32>
    %70 = tpu.matmul %68, %69, %cst_25 {dimension_numbers = #tpu.dot_dimension_numbers<[1], [0], [0], [1], [0, 0, 1, 1], [], []>} : vector<152x128xbf16>, vector<128x128xbf16>, vector<152x128xf32> -> vector<152x128xf32>
    %c0_26 = arith.constant 0 : index
    %c0_27 = arith.constant 0 : index
    %71 = vector.load %arg5[%c0_26, %c0_27] : memref<1x128xf32, #tpu.memory_space<vmem>>, vector<1x128xf32>
    %72 = vector.broadcast %71 : vector<1x128xf32> to vector<152x128xf32>
    %73 = arith.addf %70, %72 : vector<152x128xf32>
    %c0_28 = arith.constant 0 : index
    %c0_29 = arith.constant 0 : index
    %74 = vector.load %arg6[%c0_28, %c0_29] : memref<152x128xf32, #tpu.memory_space<vmem>>, vector<152x128xf32>
    tpu.vector_store %arg6[%c0_28, %c0_29], %73 {strides = array<i32>} : memref<152x128xf32, #tpu.memory_space<vmem>>, vector<152x128xf32>,
    return
  }
  func.func @transform_0(%arg0: i32) -> (i32, i32) {
    %c0_i32 = arith.constant 0 : i32
    %c0_i32_0 = arith.constant 0 : i32
    return %arg0, %c0_i32 : i32, i32
  }
  func.func @transform_1(%arg0: i32) -> (i32, i32, i32) {
    %c0_i32 = arith.constant 0 : i32
    %c0_i32_0 = arith.constant 0 : i32
    %c0_i32_1 = arith.constant 0 : i32
    %c0_i32_2 = arith.constant 0 : i32
    return %c0_i32, %c0_i32_0, %c0_i32_1 : i32, i32, i32
  }
  func.func @transform_2(%arg0: i32) -> (i32, i32) {
    %c0_i32 = arith.constant 0 : i32
    %c0_i32_0 = arith.constant 0 : i32
    %c0_i32_1 = arith.constant 0 : i32
    return %c0_i32, %c0_i32_0 : i32, i32
  }
  func.func @transform_3(%arg0: i32) -> (i32, i32) {
    %c0_i32 = arith.constant 0 : i32
    %c0_i32_0 = arith.constant 0 : i32
    %c0_i32_1 = arith.constant 0 : i32
    return %c0_i32, %c0_i32_0 : i32, i32
  }
  func.func @transform_4(%arg0: i32) -> (i32, i32) {
    %c0_i32 = arith.constant 0 : i32
    %c0_i32_0 = arith.constant 0 : i32
    %c0_i32_1 = arith.constant 0 : i32
    return %c0_i32, %c0_i32_0 : i32, i32
  }
  func.func @transform_5(%arg0: i32) -> (i32, i32) {
    %c0_i32 = arith.constant 0 : i32
    %c0_i32_0 = arith.constant 0 : i32
    return %arg0, %c0_i32 : i32, i32
  }
}

</mosaic_0001>

<bundles_post_ra>
// kernel: dependency_model_forward.1
= control target key start
LH: loop header
LB: loop body
LE: loop exit
PB: predicated region body
PF: predicated region fallthrough
CT: control target
= control target key end

     0   :  { %s2835_s18 = smov 0   ;;  %s3812_s0 = inlined_call_operand.vmem [shape: s32[304,6], index: 0, kind: input, shape index: {}]   ;;  %s3813_s1 = inlined_call_operand.vmem [shape: bf16[6,128,128], index: 1, kind: input, shape index: {}]   ;;  %s3814_s2 = inlined_call_operand.vmem [shape: f32[1,128], index: 2, kind: input, shape index: {}]   ;;  %s3815_s3 = inlined_call_operand.vmem [shape: bf16[128,128], index: 3, kind: input, shape index: {}]   ;;  %s3816_s4 = inlined_call_operand.vmem [shape: f32[1,128], index: 4, kind: input, shape index: {}]   ;;  %s3817_s5 = inlined_call_operand.vmem [shape: f32[304,128], index: 5, kind: output, shape index: {}]  }
   0x1 LB: > { %s2059_s19 = sadd.s32 4294967295, %s2796_s18   ;;  %p2063_p0 = scmp.ge.s32.totalorder %s2796_s18, 1  ;;  %s2796_s18 = sphi %s2835_s18, %s15_s18  }
   0x2   : > { %p188_p1 = scmp.lt.s32.totalorder %s2796_s18, 3 }
   0x4   : > { %p189_p2 = pnand %p2063_p0, %p188_p1 }
   0x5   : > { %s216_s20 = smul.u32 (!%p189_p2), 19, %s2059_s19 }
   0x6   : > { %192 = sbr.rel (%p189_p2) target bundleno = 792 (0x318), region = 40 }
   0x7   : > { %p217_p3 = scmp.lt.s32.totalorder (!%p189_p2), %s216_s20, 37 }
   0xb   : > { %v2798_v0 = vmov 0   ;;  %s3823_s20 = smov (!%p217_p3, %s216_s20), 37  ;;  %v2799_v15 = vmov 1   ;;  %v2922_v16 = vld [vmem:[%s3813_s1 + $0x38] sm:$0xff]  ;;  %v2932_v18 = vld [vmem:[%s3813_s1 + $0x30] sm:$0xff]  ;;  %v2941_v19 = vld [vmem:[%s3813_s1 + $0x28] sm:$0xff]  ;;  %v247_v27 = vlaneseq }
   0xc   : > { %2703 = vset.pattern.permute.xlu2 %v2798_v0  ;;  %2702 = vset.pattern.permute.xlu1 %v2798_v0  ;;  %s2064_s21 = sshll.u32 %s3823_s20, 3  ;;  %v2948_v20 = vld [vmem:[%s3813_s1 + $0x20] sm:$0xff]  ;;  %v2957_v21 = vld [vmem:[%s3813_s1 + $0x18] sm:$0xff]  ;;  %v2963_v22 = vld [vmem:[%s3813_s1 + $0x10] sm:$0xff]  ;;  %v2800_v29 = vmov 3   ;;  %v2801_v31 = vmov 2  }
   0xd   : > { %2701 = vset.pattern.permute.xlu0 %v2798_v0  ;;  %s2854_s24 = scalar_lea.vmem %s3812_s0, %s2064_s21  ;;  %2670 = vmatpush.bf16.msra.mxu1 %v2922_v16  ;;  %v2972_v23 = vld [vmem:[%s3813_s1 + $0x8] sm:$0xff]  ;;  %v2978_v24 = vld [vmem:[%s3813_s1] sm:$0xff]  ;;  %v3002_v32 = vand.u32 127, %v247_v27  ;;  %v2621_v33 = vld [vmem:[%s3813_s1 + $0x78] sm:$0xff]  ;;  %v2802_v36 = vmov 1.0|1.0   ;;  %s3765_s12 = scalar_lea.vmem %s3817_s5, %s2064_s21 }
   0xe   : > { %v2857_v1 = vld [vmem:[%s2854_s24 + $0x20] sm:$0xff]  ;;  %v2860_v2 = vld [vmem:[%s2854_s24 + $0x10] sm:$0xff]  ;;  %v2869_v4 = vld [vmem:[%s2854_s24 + $0x28] sm:$0xff]  ;;  %2662 = vmatpush.bf16.msra.mxu3 %v2621_v33  ;;  %578 = vmatpush.bf16.msra.mxu0 %v2621_v33  ;;  %v2803_v53 = vmov 4   ;;  %v2804_v57 = vmov 5  }
   0xf   : > { %v2863_v3 = vld [vmem:[%s2854_s24] sm:$0xff]  ;;  %262 = vperm.xlu2 %2703, %v2857_v1   ;;  %256 = vperm.xlu1 %2702, %v2860_v2   ;;  %v2872_v5 = vld [vmem:[%s2854_s24 + $0x18] sm:$0xff]  ;;  %v2875_v6 = vld [vmem:[%s2854_s24 + $0x8] sm:$0xff] }
  0x10   : > { %250 = vperm.xlu0 %2701, %v2863_v3   ;;  %v2881_v7 = vld [vmem:[%s2854_s24 + $0x40] sm:$0xff]  ;;  %v2884_v8 = vld [vmem:[%s2854_s24 + $0x38] sm:$0xff]  ;;  %v2887_v9 = vld [vmem:[%s2854_s24 + $0x30] sm:$0xff] }
  0x11   : > { %v2893_v10 = vld [vmem:[%s2854_s24 + $0x58] sm:$0xff]  ;;  %v2896_v11 = vld [vmem:[%s2854_s24 + $0x50] sm:$0xff]  ;;  %v2899_v12 = vld [vmem:[%s2854_s24 + $0x48] sm:$0xff]  ;;  %2671 = vmatpush.bf16.msra.mxu1 %v2932_v18 }
  0x12   : > { %v2905_v13 = vld [vmem:[%s2854_s24 + $0x68] sm:$0xff]  ;;  %v2908_v14 = vld [vmem:[%s2854_s24 + $0x60] sm:$0xff]  ;;  %v2926_v17 = vld [vmem:[%s2854_s24 + $0x70] sm:$0xff] }
  0x13   : > { %v2985_v25 = vld [vmem:[%s2854_s24 + $0x80] sm:$0xff]  ;;  %v2988_v26 = vld [vmem:[%s2854_s24 + $0x78] sm:$0xff]  ;;  %v2995_v28 = vld [vmem:[%s2854_s24 + $0x88] sm:$0xff] }
  0x14   : > { %v2620_v35 = vld [vmem:[%s3813_s1 + $0x70] sm:$0xff]  ;;  %v2619_v37 = vld [vmem:[%s3813_s1 + $0x68] sm:$0xff]  ;;  %v2618_v39 = vld [vmem:[%s3813_s1 + $0x60] sm:$0xff] }
  0x15   : > { %2672 = vmatpush.bf16.msra.mxu1 %v2941_v19  ;;  %2663 = vmatpush.bf16.msra.mxu3 %v2620_v35  ;;  %v3028_v40 = vld [vmem:[%s2854_s24 + $0x90] sm:$0xff]  ;;  %v2617_v41 = vld [vmem:[%s3813_s1 + $0x58] sm:$0xff]  ;;  %v2615_v46 = vld [vmem:[%s3813_s1 + $0x48] sm:$0xff] }
  0x16   : > { %579 = vmatpush.bf16.msra.mxu0 %v2620_v35  ;;  %v2616_v45 = vld [vmem:[%s3813_s1 + $0x50] sm:$0xff]  ;;  %v2614_v51 = vld [vmem:[%s3813_s1 + $0x40] sm:$0xff] }
  0x17   : > { %265 = vperm.xlu2 %2703, %v2869_v4   ;;  %259 = vperm.xlu1 %2702, %v2872_v5   ;;  %v2626_v33 = vld [vmem:[%s3813_s1 + $0xa0] sm:$0xff] }
  0x18   : > { %253 = vperm.xlu0 %2701, %v2875_v6  }
  0x19   : > { %2673 = vmatpush.bf16.msra.mxu1 %v2948_v20  ;;  %2664 = vmatpush.bf16.msra.mxu3 %v2619_v37 }
  0x1a   : > { %580 = vmatpush.bf16.msra.mxu0 %v2619_v37 }
  0x1d   : > { %2674 = vmatpush.bf16.msra.mxu1 %v2957_v21  ;;  %2665 = vmatpush.bf16.msra.mxu3 %v2618_v39 }
  0x1e   : > { %581 = vmatpush.bf16.msra.mxu0 %v2618_v39  ;;  %v2652_v39 = vld [vmem:[%s3813_s1 + $0x170] sm:$0xff] }
  0x1f   : > { %274 = vperm.xlu2 %2703, %v2881_v7   ;;  %271 = vperm.xlu1 %2702, %v2884_v8  }
  0x20   : > { %268 = vperm.xlu0 %2701, %v2887_v9  }
  0x21   : > { %2675 = vmatpush.bf16.msra.mxu1 %v2963_v22  ;;  %2666 = vmatpush.bf16.msra.mxu3 %v2617_v41 }
  0x22   : > { %582 = vmatpush.bf16.msra.mxu0 %v2617_v41 }
  0x25   : > { %2676 = vmatpush.bf16.msra.mxu1 %v2972_v23  ;;  %2667 = vmatpush.bf16.msra.mxu3 %v2616_v45 }
  0x26   : > { %583 = vmatpush.bf16.msra.mxu0 %v2616_v45 }
  0x27   : > { %283 = vperm.xlu2 %2703, %v2893_v10   ;;  %280 = vperm.xlu1 %2702, %v2896_v11  }
  0x28   : > { %277 = vperm.xlu0 %2701, %v2899_v12  }
  0x29   : > { %2677 = vmatpush.bf16.msra.mxu1 %v2978_v24  ;;  %2668 = vmatpush.bf16.msra.mxu3 %v2615_v46 }
  0x2a   : > { %584 = vmatpush.bf16.msra.mxu0 %v2615_v46  ;;  %v2623_v46 = vld [vmem:[%s3813_s1 + $0x88] sm:$0xff] }
  0x2d   : > { %2669 = vmatpush.bf16.msra.mxu3 %v2614_v51 }
  0x2e   : > { %585 = vmatpush.bf16.msra.mxu0 %v2614_v51  ;;  %v2622_v51 = vld [vmem:[%s3813_s1 + $0x80] sm:$0xff] }
  0x2f   : > { %2704 = vset.pattern.permute.xlu2 %v2799_v15  ;;  %289 = vperm.xlu1 %2702, %v2905_v13  }
  0x30   : > { %286 = vperm.xlu0 %2701, %v2908_v14   ;;  %402 = vperm.xlu2 %2704, %v2857_v1  }
  0x32   : > { %684 = vmatpush.bf16.msrb.mxu0 %v2922_v16 }
  0x36   : > { %685 = vmatpush.bf16.msrb.mxu0 %v2932_v18 }
  0x37   : > { %2706 = vset.pattern.permute.xlu1 %v2799_v15 }
  0x38   : > { %2705 = vset.pattern.permute.xlu0 %v2799_v15  ;;  %411 = vperm.xlu2 %2704, %v2884_v8  }
  0x39   : > { %408 = vperm.xlu1 %2706, %v2887_v9   ;;  %405 = vperm.xlu0 %2705, %v2869_v4  }
  0x3a   : > { %686 = vmatpush.bf16.msrb.mxu0 %v2941_v19 }
  0x3e   : > { %687 = vmatpush.bf16.msrb.mxu0 %v2948_v20  ;;  %v2629_v20 = vld [vmem:[%s3813_s1 + $0xb8] sm:$0xff] }
  0x3f   : > { %2678 = vmatpush.bf16.msra.mxu2 %v2629_v20 }
  0x40   : > { %414 = vperm.xlu2 %2704, %v2881_v7  }
  0x41   : > { %2707 = vset.pattern.permute.xlu1 %v2798_v0  ;;  %417 = vperm.xlu0 %2705, %v2899_v12  }
  0x42   : > { %292 = vperm.xlu1 %2707, %v2926_v17   ;;  %688 = vmatpush.bf16.msrb.mxu0 %v2957_v21  ;;  %v2637_v21 = vld [vmem:[%s3813_s1 + $0xf8] sm:$0xff] }
  0x43   : > { %1197 = vmatpush.bf16.msrb.mxu3 %v2637_v21  ;;  %v2638_v21 = vld [vmem:[%s3813_s1 + $0x100] sm:$0xff] }
  0x46   : > { %689 = vmatpush.bf16.msrb.mxu0 %v2963_v22  ;;  %v2628_v22 = vld [vmem:[%s3813_s1 + $0xb0] sm:$0xff] }
  0x47   : > { %2679 = vmatpush.bf16.msra.mxu2 %v2628_v22 }
  0x48   : > { %393 = vperm.xlu2 %2704, %v2875_v6  }
  0x49   : > { %420 = vperm.xlu0 %2705, %v2896_v11  }
  0x4a   : > { %2708 = vset.pattern.permute.xlu1 %v2799_v15  ;;  %690 = vmatpush.bf16.msrb.mxu0 %v2972_v23 }
  0x4b   : > { %390 = vperm.xlu1 %2708, %v2863_v3  }
  0x4e   : > { %691 = vmatpush.bf16.msrb.mxu0 %v2978_v24 }
  0x50   : > { %396 = vperm.xlu2 %2704, %v2860_v2  }
  0x51   : > { %399 = vperm.xlu0 %2705, %v2872_v5  }
  0x53   : > { %423 = vperm.xlu1 %2708, %v2893_v10  }
  0x58   : > { %429 = vperm.xlu2 %2704, %v2905_v13  }
  0x59   : > { %432 = vperm.xlu0 %2705, %v2926_v17  }
  0x5b   : > { %426 = vperm.xlu1 %2708, %v2908_v14  }
  0x60   : > { %2709 = vset.pattern.permute.xlu2 %v2798_v0 }
  0x61   : > { %438 = vperm.xlu0 %2705, %v2985_v25   ;;  %295 = vperm.xlu2 %2709, %v2988_v26  }
  0x63   : > { %435 = vperm.xlu1 %2708, %v2988_v26  }
  0x69   : > { %2717 = vset.pattern.permute.xlu0 %v2800_v29  ;;  %v263_v30 = vpop.permute.xlu2 %262  ;;  %2710 = vset.pattern.permute.xlu2 %v2801_v31 }
  0x6a   : > { %1012 = vperm.xlu0 %2717, %v2875_v6   ;;  %743 = vperm.xlu2 %2710, %v2863_v3   ;;  %vm310_vm0 = vcmp.eq.s32.totalorder %v263_v30, %v3002_v32  ;;  %v2627_v30 = vld [vmem:[%s3813_s1 + $0xa8] sm:$0xff] }
  0x6b   : > { %441 = vperm.xlu1 %2708, %v2995_v28   ;;  %2680 = vmatpush.bf16.msra.mxu2 %v2627_v30 }
  0x6f   : > { %2681 = vmatpush.bf16.msra.mxu2 %v2626_v33 }
  0x71   : > { %v266_v34 = vpop.permute.xlu2 %265 }
  0x72   : > { %vm311_vm1 = vcmp.eq.s32.totalorder %v266_v34, %v3002_v32  ;;  %1015 = vperm.xlu0 %2717, %v2860_v2   ;;  %2712 = vset.pattern.permute.xlu2 %v2798_v0 }
  0x73   : > { %vm2208_vm2 = vmpackc.low %vm311_vm1, %vm310_vm0  ;;  %2711 = vset.pattern.permute.xlu1 %v2798_v0  ;;  %301 = vperm.xlu2 %2712, %v2995_v28  }
  0x74   : > { %298 = vperm.xlu1 %2711, %v2985_v25   ;;  %2209 = vmatmul.msk.bf16.vlgmr.msra.gmra.mxu1 %vm2208_vm2, %v2802_v36 }
  0x79   : > { %v3021_v38 = vpop.permute.xlu2 %274 }
  0x7a   : > { %1021 = vperm.xlu0 %2717, %v2857_v1   ;;  %vm314_vm13 = vcmp.eq.s32.totalorder %v3021_v38, %v3002_v32  ;;  %v2653_v38 = vld [vmem:[%s3813_s1 + $0x178] sm:$0xff] }
  0x7b   : > { %2714 = vset.pattern.permute.xlu2 %v2801_v31  ;;  %1729 = vmatpush.bf16.msrb.mxu1 %v2653_v38  ;;  %v2630_v38 = vld [vmem:[%s3813_s1 + $0xc0] sm:$0xff] }
  0x7c   : > { %2713 = vset.pattern.permute.xlu1 %v2799_v15  ;;  %749 = vperm.xlu2 %2714, %v2860_v2  }
  0x7d   : > { %444 = vperm.xlu1 %2713, %v3028_v40  }
  0x7f   : > { %1730 = vmatpush.bf16.msrb.mxu1 %v2652_v39 }
  0x81   : > { %v3037_v42 = vpop.permute.xlu2 %283  ;;  %v257_v43 = vpop.permute.xlu1 %256 }
  0x82   : > { %2728 = vset.pattern.permute.xlu0 %v2801_v31  ;;  %v251_v44 = vpop.permute.xlu0 %250  ;;  %vm308_vm4 = vcmp.eq.s32.totalorder %v257_v43, %v3002_v32 }
  0x83   : > { %746 = vperm.xlu0 %2728, %v2875_v6   ;;  %vm306_vm3 = vcmp.eq.s32.totalorder %v251_v44, %v3002_v32  ;;  %v2651_v44 = vld [vmem:[%s3813_s1 + $0x168] sm:$0xff] }
  0x84   : > { %2716 = vset.pattern.permute.xlu2 %v2800_v29  ;;  %1731 = vmatpush.bf16.msrb.mxu1 %v2651_v44 }
  0x85   : > { %2715 = vset.pattern.permute.xlu1 %v2798_v0  ;;  %1009 = vperm.xlu2 %2716, %v2863_v3  }
  0x86   : > { %304 = vperm.xlu1 %2715, %v3028_v40  }
  0x89   : > { %v260_v47 = vpop.permute.xlu1 %259 }
  0x8a   : > { %vm309_vm5 = vcmp.eq.s32.totalorder %v260_v47, %v3002_v32  ;;  %v254_v48 = vpop.permute.xlu0 %253  ;;  %v3054_v49 = vpop.permute.xlu2 %402  ;;  %v2650_v47 = vld [vmem:[%s3813_s1 + $0x160] sm:$0xff] }
  0x8b   : > { %vm3056_vm6 = vmpackc.low %vm309_vm5, %vm308_vm4  ;;  %vm307_vm7 = vcmp.eq.s32.totalorder %v254_v48, %v3002_v32  ;;  %752 = vperm.xlu0 %2728, %v2872_v5   ;;  %vm450_vm0 = vcmp.eq.s32.totalorder %v3054_v49, %v3002_v32  ;;  %1732 = vmatpush.bf16.msrb.mxu1 %v2650_v47 }
  0x8c   : > { %vm3065_vm8 = vmpackc.low %vm307_vm7, %vm306_vm3  ;;  %vm317_vm3 = vcmp.eq.s32.totalorder %v3037_v42, %v3002_v32  ;;  %v2624_v42 = vld [vmem:[%s3813_s1 + $0x90] sm:$0xff] }
  0x8d   : > { %2719 = vset.pattern.permute.xlu2 %v2803_v53 }
  0x8e   : > { %2718 = vset.pattern.permute.xlu1 %v2803_v53  ;;  %1278 = vperm.xlu2 %2719, %v2875_v6  }
  0x8f   : > { %1275 = vperm.xlu1 %2718, %v2863_v3  }
  0x91   : > { %v272_v54 = vpop.permute.xlu1 %271 }
  0x92   : > { %vm313_vm9 = vcmp.eq.s32.totalorder %v272_v54, %v3002_v32  ;;  %v269_v55 = vpop.permute.xlu0 %268  ;;  %v3075_v56 = vpop.permute.xlu2 %411  ;;  %v2649_v54 = vld [vmem:[%s3813_s1 + $0x158] sm:$0xff] }
  0x93   : > { %vm312_vm10 = vcmp.eq.s32.totalorder %v269_v55, %v3002_v32  ;;  %758 = vperm.xlu0 %2728, %v2869_v4   ;;  %vm453_vm7 = vcmp.eq.s32.totalorder %v3075_v56, %v3002_v32  ;;  %v2645_v56 = vld [vmem:[%s3813_s1 + $0x138] sm:$0xff]  ;;  %1733 = vmatpush.bf16.msrb.mxu1 %v2649_v54 }
  0x94   : > { %vm2210_vm11 = vmpackc.low %vm313_vm9, %vm312_vm10 }
  0x95   : > { %2211 = vmatmul.msk.bf16.gmra.mxu1 %vm2210_vm11, %v2802_v36 }
  0x96   : > { %2721 = vset.pattern.permute.xlu2 %v2804_v57 }
  0x97   : > { %2720 = vset.pattern.permute.xlu1 %v2804_v57  ;;  %1544 = vperm.xlu2 %2721, %v2875_v6  }
  0x98   : > { %1541 = vperm.xlu1 %2720, %v2863_v3  }
  0x99   : > { %v281_v58 = vpop.permute.xlu1 %280 }
  0x9a   : > { %v278_v59 = vpop.permute.xlu0 %277  ;;  %v3086_v60 = vpop.permute.xlu2 %414  ;;  %vm316_vm2 = vcmp.eq.s32.totalorder %v281_v58, %v3002_v32  ;;  %v2648_v58 = vld [vmem:[%s3813_s1 + $0x150] sm:$0xff] }
  0x9b   : > { %767 = vperm.xlu0 %2728, %v2881_v7   ;;  %vm315_vm12 = vcmp.eq.s32.totalorder %v278_v59, %v3002_v32  ;;  %vm2214_vm4 = vmpackc.low %vm317_vm3, %vm316_vm2  ;;  %vm454_vm2 = vcmp.eq.s32.totalorder %v3086_v60, %v3002_v32  ;;  %v2635_v59 = vld [vmem:[%s3813_s1 + $0xe8] sm:$0xff]  ;;  %v2644_v60 = vld [vmem:[%s3813_s1 + $0x130] sm:$0xff]  ;;  %1734 = vmatpush.bf16.msrb.mxu1 %v2648_v58 }
  0x9c   : > { %vm2212_vm14 = vmpackc.low %vm315_vm12, %vm314_vm13 }
  0x9f   : > { %2723 = vset.pattern.permute.xlu2 %v2801_v31 }
  0xa0   : > { %2722 = vset.pattern.permute.xlu1 %v2800_v29  ;;  %755 = vperm.xlu2 %2723, %v2857_v1  }
  0xa1   : > { %1018 = vperm.xlu1 %2722, %v2872_v5   ;;  %v3095_v61 = vpop.permute.xlu1 %289 }
  0xa2   : > { %v287_v62 = vpop.permute.xlu0 %286  ;;  %v394_v63 = vpop.permute.xlu2 %393  ;;  %vm319_vm13 = vcmp.eq.s32.totalorder %v3095_v61, %v3002_v32 }
  0xa3   : > { %2741 = vset.pattern.permute.xlu0 %v2804_v57  ;;  %vm447_vm9 = vcmp.eq.s32.totalorder %v394_v63, %v3002_v32 }
  0xa4   : > { %1562 = vperm.xlu0 %2741, %v2884_v8  }
  0xa5   : > { %2213 = vmatmul.msk.bf16.gmra.mxu1 %vm2212_vm14, %v2802_v36  ;;  %vm318_vm14 = vcmp.eq.s32.totalorder %v287_v62, %v3002_v32  ;;  %v2647_v62 = vld [vmem:[%s3813_s1 + $0x148] sm:$0xff] }
  0xa6   : > { %1735 = vmatpush.bf16.msrb.mxu1 %v2647_v62 }
  0xa8   : > { %2725 = vset.pattern.permute.xlu2 %v2803_v53 }
  0xa9   : > { %2724 = vset.pattern.permute.xlu1 %v2803_v53  ;;  %1284 = vperm.xlu2 %2725, %v2872_v5  }
  0xaa   : > { %1281 = vperm.xlu1 %2724, %v2860_v2   ;;  %v3108_v0 = vpop.permute.xlu2 %396 }
  0xab   : > { %v409_v3 = vpop.permute.xlu1 %408  ;;  %v406_v6 = vpop.permute.xlu0 %405  ;;  %vm448_vm3 = vcmp.eq.s32.totalorder %v3108_v0, %v3002_v32  ;;  %v2643_v0 = vld [vmem:[%s3813_s1 + $0x128] sm:$0xff] }
  0xac   : > { %vm451_vm15 = vcmp.eq.s32.totalorder %v406_v6, %v3002_v32  ;;  %2742 = vset.pattern.permute.xlu0 %v2803_v53  ;;  %vm452_vm5 = vcmp.eq.s32.totalorder %v409_v3, %v3002_v32  ;;  %v2646_v3 = vld [vmem:[%s3813_s1 + $0x140] sm:$0xff] }
  0xad   : > { %1290 = vperm.xlu0 %2742, %v2869_v4   ;;  %vm2156_vm1 = vmpackc.low %vm451_vm15, %vm450_vm0  ;;  %1736 = vmatpush.bf16.msrb.mxu1 %v2646_v3 }
  0xae   : > { %2157 = vmatmul.msk.bf16.vlgmr.msra.gmra.mxu3 %vm2156_vm1, %v2802_v36  ;;  %vm2158_vm10 = vmpackc.low %vm453_vm7, %vm452_vm5 }
  0xaf   : > { %vm2216_vm15 = vmpackc.low %vm319_vm13, %vm318_vm14 }
  0xb1   : > { %2727 = vset.pattern.permute.xlu2 %v2804_v57 }
  0xb2   : > { %2726 = vset.pattern.permute.xlu1 %v2804_v57  ;;  %v3121_v15 = vpop.permute.xlu2 %429  ;;  %1550 = vperm.xlu2 %2727, %v2872_v5  }
  0xb3   : > { %1547 = vperm.xlu1 %2726, %v2860_v2   ;;  %v418_v16 = vpop.permute.xlu0 %417 }
  0xb4   : > { %v3127_v18 = vpop.permute.xlu1 %292  ;;  %vm455_vm0 = vcmp.eq.s32.totalorder %v418_v16, %v3002_v32 }
  0xb5   : > { %2215 = vmatmul.msk.bf16.gmra.mxu1 %vm2214_vm4, %v2802_v36  ;;  %1299 = vperm.xlu0 %2742, %v2881_v7   ;;  %vm2160_vm4 = vmpackc.low %vm455_vm0, %vm454_vm2 }
  0xba   : > { %2730 = vset.pattern.permute.xlu2 %v2801_v31 }
  0xbb   : > { %2729 = vset.pattern.permute.xlu1 %v2800_v29  ;;  %v3134_v5 = vpop.permute.xlu0 %420  ;;  %761 = vperm.xlu2 %2730, %v2887_v9   ;;  %v3137_v19 = vpop.permute.xlu2 %295 }
  0xbc   : > { %1024 = vperm.xlu1 %2729, %v2869_v4   ;;  %vm321_vm7 = vcmp.eq.s32.totalorder %v3137_v19, %v3002_v32 }
  0xbd   : > { %v391_v2 = vpop.permute.xlu1 %390  ;;  %2751 = vset.pattern.permute.xlu0 %v2800_v29 }
  0xbe   : > { %vm446_vm11 = vcmp.eq.s32.totalorder %v391_v2, %v3002_v32  ;;  %1042 = vperm.xlu0 %2751, %v2893_v10   ;;  %2159 = vmatmul.msk.bf16.gmra.mxu3 %vm2158_vm10, %v2802_v36  ;;  %v2639_v2 = vld [vmem:[%s3813_s1 + $0x108] sm:$0xff] }
  0xbf   : > { %vm2152_vm12 = vmpackc.low %vm447_vm9, %vm446_vm11  ;;  %vm320_vm9 = vcmp.eq.s32.totalorder %v3127_v18, %v3002_v32  ;;  %vm456_vm11 = vcmp.eq.s32.totalorder %v3134_v5, %v3002_v32  ;;  %v2640_v18 = vld [vmem:[%s3813_s1 + $0x110] sm:$0xff]  ;;  %v2634_v5 = vld [vmem:[%s3813_s1 + $0xe0] sm:$0xff] }
  0xc0   : > { %2153 = vmatmul.msk.bf16.vlgmr.msra.gmra.mxu0 %vm2152_vm12, %v2802_v36  ;;  %vm2218_vm10 = vmpackc.low %vm321_vm7, %vm320_vm9 }
  0xc1   : > { %931 = vmatpush.bf16.msra.mxu0 %v2629_v20 }
  0xc3   : > { %v400_v23 = vpop.permute.xlu0 %399  ;;  %2732 = vset.pattern.permute.xlu2 %v2803_v53 }
  0xc4   : > { %2731 = vset.pattern.permute.xlu1 %v2801_v31  ;;  %1287 = vperm.xlu2 %2732, %v2857_v1   ;;  %v3163_v24 = vpop.permute.xlu2 %743  ;;  %vm449_vm1 = vcmp.eq.s32.totalorder %v400_v23, %v3002_v32 }
  0xc5   : > { %764 = vperm.xlu1 %2731, %v2884_v8   ;;  %v3166_v27 = vpop.permute.xlu1 %423  ;;  %2217 = vmatmul.msk.bf16.gmra.mxu1 %vm2216_vm15, %v2802_v36  ;;  %vm2154_vm5 = vmpackc.low %vm449_vm1, %vm448_vm3  ;;  %vm459_vm1 = vcmp.eq.s32.totalorder %v3121_v15, %v3002_v32  ;;  %vm799_vm9 = vcmp.eq.s32.totalorder %v3163_v24, %v3002_v32  ;;  %v2632_v24 = vld [vmem:[%s3813_s1 + $0xd0] sm:$0xff] }
  0xc6   : > { %932 = vmatpush.bf16.msra.mxu0 %v2628_v22  ;;  %2756 = vset.pattern.permute.xlu0 %v2804_v57  ;;  %vm457_vm12 = vcmp.eq.s32.totalorder %v3166_v27, %v3002_v32  ;;  %v2633_v22 = vld [vmem:[%s3813_s1 + $0xd8] sm:$0xff] }
  0xc7   : > { %1571 = vperm.xlu0 %2756, %v2896_v11   ;;  %vm2162_vm13 = vmpackc.low %vm457_vm12, %vm456_vm11 }
  0xca   : > { %933 = vmatpush.bf16.msra.mxu0 %v2627_v30 }
  0xcb   : > { %v3178_v34 = vpop.permute.xlu0 %432 }
  0xcc   : > { %2734 = vset.pattern.permute.xlu2 %v2804_v57 }
  0xcd   : > { %2733 = vset.pattern.permute.xlu1 %v2804_v57  ;;  %v3185_v35 = vpop.permute.xlu1 %426  ;;  %1556 = vperm.xlu2 %2734, %v2869_v4   ;;  %v3188_v37 = vpop.permute.xlu2 %301  ;;  %v2625_v4 = vld [vmem:[%s3813_s1 + $0x98] sm:$0xff] }
  0xce   : > { %1553 = vperm.xlu1 %2733, %v2857_v1   ;;  %934 = vmatpush.bf16.msra.mxu0 %v2626_v33  ;;  %v2636_v1 = vld [vmem:[%s3813_s1 + $0xf0] sm:$0xff]  ;;  %vm458_vm0 = vcmp.eq.s32.totalorder %v3185_v35, %v3002_v32 }
  0xcf   : > { %2161 = vmatmul.msk.bf16.gmra.mxu3 %vm2160_vm4, %v2802_v36  ;;  %2761 = vset.pattern.permute.xlu0 %v2801_v31  ;;  %vm2164_vm2 = vmpackc.low %vm459_vm1, %vm458_vm0  ;;  %vm460_vm4 = vcmp.eq.s32.totalorder %v3178_v34, %v3002_v32  ;;  %v2631_v34 = vld [vmem:[%s3813_s1 + $0xc8] sm:$0xff] }
  0xd0   : > { %2155 = vmatmul.msk.bf16.gmra.mxu0 %vm2154_vm5, %v2802_v36  ;;  %788 = vperm.xlu0 %2761, %v2988_v26  }
  0xd1   : > { %1198 = vmatpush.bf16.msrb.mxu3 %v2636_v1  ;;  %2682 = vmatpush.bf16.msra.mxu2 %v2625_v4 }
  0xd2   : > { %935 = vmatpush.bf16.msra.mxu0 %v2625_v4 }
  0xd3   : > { %v3213_v41 = vpop.permute.xlu0 %438 }
  0xd5   : > { %v3218_v43 = vpop.permute.xlu1 %435  ;;  %2219 = vmatmul.msk.bf16.gmra.mxu1 %vm2218_vm10, %v2802_v36  ;;  %2736 = vset.pattern.permute.xlu2 %v2800_v29 }
  0xd6   : > { %2735 = vset.pattern.permute.xlu1 %v2800_v29  ;;  %1030 = vperm.xlu2 %2736, %v2884_v8   ;;  %v3227_v45 = vpop.permute.xlu2 %749  ;;  %vm461_vm5 = vcmp.eq.s32.totalorder %v3218_v43, %v3002_v32 }
  0xd7   : > { %1027 = vperm.xlu1 %2735, %v2887_v9   ;;  %936 = vmatpush.bf16.msra.mxu0 %v2624_v42  ;;  %vm2166_vm10 = vmpackc.low %vm461_vm5, %vm460_vm4  ;;  %vm801_vm4 = vcmp.eq.s32.totalorder %v3227_v45, %v3002_v32 }
  0xd8   : > { %2683 = vmatpush.bf16.msra.mxu2 %v2624_v42  ;;  %2766 = vset.pattern.permute.xlu0 %v2800_v29 }
  0xd9   : > { %1051 = vperm.xlu0 %2766, %v2926_v17   ;;  %1199 = vmatpush.bf16.msrb.mxu3 %v2635_v59 }
  0xdb   : > { %937 = vmatpush.bf16.msra.mxu0 %v2623_v46 }
  0xdc   : > { %v3242_v48 = vpop.permute.xlu0 %1012  ;;  %2684 = vmatpush.bf16.msra.mxu2 %v2623_v46 }
  0xdd   : > { %v3244_v49 = vpop.permute.xlu1 %441  ;;  %1200 = vmatpush.bf16.msrb.mxu3 %v2634_v5  ;;  %v2786_v5 = vld [vmem:[%s2854_s24 + $0x70] sm:$0xff] }
  0xde   : > { %2738 = vset.pattern.permute.xlu2 %v2803_v53  ;;  %vm463_vm0 = vcmp.eq.s32.totalorder %v3244_v49, %v3002_v32 }
  0xdf   : > { %2163 = vmatmul.msk.bf16.gmra.mxu3 %vm2162_vm13, %v2802_v36  ;;  %2737 = vset.pattern.permute.xlu1 %v2801_v31  ;;  %v3255_v55 = vpop.permute.xlu2 %1009 }
  0xe0   : > { %770 = vperm.xlu1 %2737, %v2899_v12   ;;  %2205 = vmatmul.msk.bf16.vlgmr.msrb.gmra.mxu0 %vm3065_vm8, %v2802_v36  ;;  %vm323_vm8 = vcmp.eq.s32.totalorder %v3188_v37, %v3002_v32 }
  0xe1   : > { %1293 = vperm.xlu2 %2738, %v2887_v9   ;;  %938 = vmatpush.bf16.msra.mxu0 %v2622_v51 }
  0xe2   : > { %2685 = vmatpush.bf16.msra.mxu2 %v2622_v51  ;;  %2771 = vset.pattern.permute.xlu0 %v2803_v53 }
  0xe3   : > { %1320 = vperm.xlu0 %2771, %v2988_v26   ;;  %1201 = vmatpush.bf16.msrb.mxu3 %v2633_v22 }
  0xe4   : > { %v3272_v52 = vpop.permute.xlu0 %1015 }
  0xe5   : > { %1463 = vmatpush.bf16.msrb.mxu0 %v2645_v56 }
  0xe6   : > { %v299_v61 = vpop.permute.xlu1 %298 }
  0xe7   : > { %vm322_vm14 = vcmp.eq.s32.totalorder %v299_v61, %v3002_v32  ;;  %1202 = vmatpush.bf16.msrb.mxu3 %v2632_v24 }
  0xe8   : > { %vm2220_vm15 = vmpackc.low %vm323_vm8, %vm322_vm14  ;;  %2739 = vset.pattern.permute.xlu1 %v2803_v53  ;;  %v3285_v63 = vpop.permute.xlu2 %1278 }
  0xe9   : > { %1464 = vmatpush.bf16.msrb.mxu0 %v2644_v60  ;;  %1296 = vperm.xlu1 %2739, %v2884_v8   ;;  %v2642_v8 = vld [vmem:[%s3813_s1 + $0x120] sm:$0xff] }
  0xea   : > { %2221 = vmatmul.msk.bf16.gmra.mxu1 %vm2220_vm15, %v2802_v36  ;;  %2740 = vset.pattern.permute.xlu2 %v2804_v57  ;;  %vm462_vm15 = vcmp.eq.s32.totalorder %v3213_v41, %v3002_v32 }
  0xeb   : > { %1559 = vperm.xlu2 %2740, %v2887_v9   ;;  %2776 = vset.pattern.permute.xlu0 %v2801_v31  ;;  %v2641_v9 = vld [vmem:[%s3813_s1 + $0x118] sm:$0xff] }
  0xec   : > { %v3299_v6 = vpop.permute.xlu0 %1021  ;;  %797 = vperm.xlu0 %2776, %v3028_v40   ;;  %1203 = vmatpush.bf16.msrb.mxu3 %v2631_v34 }
  0xed   : > { %1465 = vmatpush.bf16.msrb.mxu0 %v2643_v0 }
  0xef   : > { %2165 = vmatmul.msk.bf16.gmra.mxu3 %vm2164_vm2, %v2802_v36  ;;  %v3309_v16 = vpop.permute.xlu1 %444 }
  0xf0   : > { %2207 = vmatmul.msk.bf16.gmra.mxu0 %vm3056_vm6, %v2802_v36  ;;  %1204 = vmatpush.bf16.msrb.mxu3 %v2630_v38 }
  0xf1   : > { %1466 = vmatpush.bf16.msrb.mxu0 %v2642_v8  ;;  %2743 = vset.pattern.permute.xlu1 %v2800_v29  ;;  %v1545_v15 = vpop.permute.xlu2 %1544  ;;  %v3353_v23 = vpop.f32.mrf.mxu1 }
  0xf2   : > { %1033 = vperm.xlu1 %2743, %v2881_v7   ;;  %vm1598_vm14 = vcmp.eq.s32.totalorder %v1545_v15, %v3002_v32 }
  0xf3   : > { %2744 = vset.pattern.permute.xlu2 %v2800_v29 }
  0xf4   : > { %1036 = vperm.xlu2 %2744, %v2899_v12   ;;  %2781 = vset.pattern.permute.xlu0 %v2800_v29 }
  0xf5   : > { %1467 = vmatpush.bf16.msrb.mxu0 %v2641_v9  ;;  %v747_v50 = vpop.permute.xlu0 %746  ;;  %1063 = vperm.xlu0 %2781, %v3028_v40  }
  0xf6   : > { %vm800_vm7 = vcmp.eq.s32.totalorder %v747_v50, %v3002_v32 }
  0xf7   : > { %vm2291_vm11 = vmpackc.low %vm800_vm7, %vm799_vm9  ;;  %vm464_vm7 = vcmp.eq.s32.totalorder %v3309_v16, %v3002_v32  ;;  %vm1332_vm9 = vcmp.eq.s32.totalorder %v3285_v63, %v3002_v32 }
  0xf8   : > { %v305_v19 = vpop.permute.xlu1 %304 }
  0xf9   : > { %1468 = vmatpush.bf16.msrb.mxu0 %v2640_v18  ;;  %vm324_vm6 = vcmp.eq.s32.totalorder %v305_v19, %v3002_v32  ;;  %v3372_v35 = vpop.f32.mrf.mxu1 }
  0xfa   : > { %vm2222_vm3 = vmpackc.low %vm324_vm6, %vm324_vm6  ;;  %2745 = vset.pattern.permute.xlu1 %v2801_v31  ;;  %v756_v40 = vpop.permute.xlu2 %755 }
  0xfb   : > { %773 = vperm.xlu1 %2745, %v2896_v11   ;;  %2223 = vmatmul.msk.bf16.gmra.mxu1 %vm2222_vm3, %v2802_v36  ;;  %vm803_vm12 = vcmp.eq.s32.totalorder %v756_v40, %v3002_v32  ;;  %vm2168_vm3 = vmpackc.low %vm463_vm0, %vm462_vm15  ;;  %vm1066_vm15 = vcmp.eq.s32.totalorder %v3242_v48, %v3002_v32  ;;  %vm1065_vm0 = vcmp.eq.s32.totalorder %v3255_v55, %v3002_v32 }
  0xfc   : > { %2746 = vset.pattern.permute.xlu2 %v2801_v31 }
  0xfd   : > { %1469 = vmatpush.bf16.msrb.mxu0 %v2639_v2  ;;  %v753_v20 = vpop.permute.xlu0 %752  ;;  %776 = vperm.xlu2 %2746, %v2893_v10  }
  0xfe   : > { %2783 = vset.pattern.permute.xlu0 %v2804_v57  ;;  %vm802_vm2 = vcmp.eq.s32.totalorder %v753_v20, %v3002_v32 }
  0xff   : > { %2167 = vmatmul.msk.bf16.gmra.mxu3 %vm2166_vm10, %v2802_v36  ;;  %vm2293_vm5 = vmpackc.low %vm802_vm2, %vm801_vm4 }
 0x100   : > { %2292 = vmatmul.msk.bf16.vlgmr.msra.gmra.mxu0 %vm2291_vm11, %v2802_v36  ;;  %vm2170_vm11 = vmpackc.low %vm464_vm7, %vm464_vm7 }
 0x101   : > { %v1276_v27 = vpop.permute.xlu1 %1275  ;;  %1470 = vmatpush.bf16.msrb.mxu0 %v2638_v21 }
 0x102   : > { %vm1331_vm10 = vcmp.eq.s32.totalorder %v1276_v27, %v3002_v32 }
 0x103   : > { %2747 = vset.pattern.permute.xlu1 %v2803_v53  ;;  %v3360_v30 = vpop.permute.xlu2 %1284 }
 0x104   : > { %1302 = vperm.xlu1 %2747, %v2899_v12  }
 0x105   : > { %v759_v33 = vpop.permute.xlu0 %758  ;;  %2748 = vset.pattern.permute.xlu2 %v2804_v57 }
 0x106   : > { %vm804_vm13 = vcmp.eq.s32.totalorder %v759_v33, %v3002_v32  ;;  %1565 = vperm.xlu2 %2748, %v2881_v7  }
 0x107   : > { %vm2295_vm8 = vmpackc.low %vm804_vm13, %vm803_vm12 }
 0x108   : > { %2296 = vmatmul.msk.bf16.vlgmr.msra.gmra.mxu2 %vm2295_vm8, %v2802_v36  ;;  %vm2465_vm12 = vmpackc.low %vm1332_vm9, %vm1331_vm10  ;;  %vm1067_vm9 = vcmp.eq.s32.totalorder %v3272_v52, %v3002_v32 }
 0x10a   : > { %v1542_v37 = vpop.permute.xlu1 %1541 }
 0x10b   : > { %vm1597_vm1 = vcmp.eq.s32.totalorder %v1542_v37, %v3002_v32  ;;  %v2787_v37 = vld [vmem:[%s2854_s24 + $0x80] sm:$0xff] }
 0x10c   : > { %vm2552_vm6 = vmpackc.low %vm1598_vm14, %vm1597_vm1  ;;  %2749 = vset.pattern.permute.xlu1 %v2804_v57  ;;  %v1551_v7 = vpop.permute.xlu2 %1550  ;;  %vm1334_vm1 = vcmp.eq.s32.totalorder %v3360_v30, %v3002_v32 }
 0x10d   : > { %1568 = vperm.xlu1 %2749, %v2899_v12   ;;  %2553 = vmatmul.msk.bf16.vlgmr.msrb.gmra.mxu1 %vm2552_vm6, %v2802_v36  ;;  %vm1600_vm13 = vcmp.eq.s32.totalorder %v1551_v7, %v3002_v32  ;;  %v3416_v45 = vpop.permute.xlu0 %767  ;;  %vm2378_vm6 = vmpackc.low %vm1066_vm15, %vm1065_vm0 }
 0x10e   : > { %2750 = vset.pattern.permute.xlu2 %v2800_v29 }
 0x10f   : > { %2169 = vmatmul.msk.bf16.gmra.mxu3 %vm2168_vm3, %v2802_v36  ;;  %1039 = vperm.xlu2 %2750, %v2896_v11  }
 0x110   : > { %2294 = vmatmul.msk.bf16.gmra.mxu0 %vm2293_vm5, %v2802_v36 }
 0x112   : > { %v3392_v4 = vpop.f32.mrf.mxu1 }
 0x113   : > { %v3394_v39 = vpop.permute.xlu1 %1018 }
 0x114   : > { %vm1068_vm10 = vcmp.eq.s32.totalorder %v3394_v39, %v3002_v32 }
 0x115   : > { %2752 = vset.pattern.permute.xlu1 %v2801_v31  ;;  %v762_v12 = vpop.permute.xlu2 %761 }
 0x116   : > { %779 = vperm.xlu1 %2752, %v2908_v14   ;;  %v1563_v47 = vpop.permute.xlu0 %1562  ;;  %vm805_vm4 = vcmp.eq.s32.totalorder %v762_v12, %v3002_v32 }
 0x117   : > { %2753 = vset.pattern.permute.xlu2 %v2801_v31 }
 0x118   : > { %782 = vperm.xlu2 %2753, %v2905_v13  }
 0x11a   : > { %v3400_v1 = vpop.f32.mrf.mxu1 }
 0x11c   : > { %v1282_v41 = vpop.permute.xlu1 %1281 }
 0x11d   : > { %vm1333_vm2 = vcmp.eq.s32.totalorder %v1282_v41, %v3002_v32 }
 0x11e   : > { %2754 = vset.pattern.permute.xlu1 %v2803_v53  ;;  %v1288_v42 = vpop.permute.xlu2 %1287  ;;  %vm2467_vm3 = vmpackc.low %vm1334_vm1, %vm1333_vm2  ;;  %vm1069_vm1 = vcmp.eq.s32.totalorder %v3299_v6, %v3002_v32 }
 0x11f   : > { %2171 = vmatmul.msk.bf16.gmra.mxu3 %vm2170_vm11, %v2802_v36  ;;  %1305 = vperm.xlu1 %2754, %v2896_v11   ;;  %v1291_v56 = vpop.permute.xlu0 %1290  ;;  %vm1335_vm11 = vcmp.eq.s32.totalorder %v1288_v42, %v3002_v32  ;;  %v2788_v42 = vld [vmem:[%s2854_s24 + $0x88] sm:$0xff] }
 0x120   : > { %2466 = vmatmul.msk.bf16.vlgmr.msrb.gmra.mxu0 %vm2465_vm12, %v2802_v36  ;;  %2755 = vset.pattern.permute.xlu2 %v2803_v53  ;;  %vm1336_vm12 = vcmp.eq.s32.totalorder %v1291_v56, %v3002_v32 }
 0x121   : > { %1308 = vperm.xlu2 %2755, %v2893_v10  }
 0x122   : > { %v3413_v43 = vpop.f32.mrf.mxu1 }
 0x125   : > { %v1548_v44 = vpop.permute.xlu1 %1547 }
 0x126   : > { %vm1599_vm8 = vcmp.eq.s32.totalorder %v1548_v44, %v3002_v32 }
 0x127   : > { %vm2554_vm14 = vmpackc.low %vm1600_vm13, %vm1599_vm8  ;;  %2757 = vset.pattern.permute.xlu1 %v2804_v57  ;;  %v1557_v46 = vpop.permute.xlu2 %1556  ;;  %v1300_v7 = vpop.permute.xlu0 %1299 }
 0x128   : > { %1574 = vperm.xlu1 %2757, %v2893_v10   ;;  %2555 = vmatmul.msk.bf16.gmra.mxu1 %vm2554_vm14, %v2802_v36  ;;  %vm2380_vm13 = vmpackc.low %vm1068_vm10, %vm1067_vm9  ;;  %vm1602_vm14 = vcmp.eq.s32.totalorder %v1557_v46, %v3002_v32 }
 0x129   : > { %2758 = vset.pattern.permute.xlu2 %v2800_v29  ;;  %vm2469_vm8 = vmpackc.low %vm1336_vm12, %vm1335_vm11 }
 0x12a   : > { %v3423_v11 = vpop.f32.mrf.mxu1  ;;  %1045 = vperm.xlu2 %2758, %v2908_v14  }
 0x12e   : > { %v1025_v10 = vpop.permute.xlu1 %1024 }
 0x12f   : > { %2379 = vmatmul.msk.bf16.vlgmr.msrb.gmra.mxu3 %vm2378_vm6, %v2802_v36  ;;  %vm1070_vm2 = vcmp.eq.s32.totalorder %v1025_v10, %v3002_v32  ;;  %vm1604_vm6 = vcmp.eq.s32.totalorder %v1563_v47, %v3002_v32 }
 0x130   : > { %2759 = vset.pattern.permute.xlu1 %v2800_v29  ;;  %2468 = vmatmul.msk.bf16.gmra.mxu0 %vm2467_vm3, %v2802_v36  ;;  %v3437_v48 = vpop.permute.xlu2 %1030  ;;  %v1043_v10 = vpop.permute.xlu0 %1042 }
 0x131   : > { %1048 = vperm.xlu1 %2759, %v2905_v13   ;;  %v597_v49 = vpop.f32.mrf.mxu3  ;;  %vm1072_vm11 = vcmp.eq.s32.totalorder %v3437_v48, %v3002_v32 }
 0x132   : > { %v3439_v51 = vpop.f32.mrf.mxu1  ;;  %2760 = vset.pattern.permute.xlu2 %v2801_v31  ;;  %v3443_v54 = vadd.f32 %v3353_v23, %v597_v49 }
 0x133   : > { %785 = vperm.xlu2 %2760, %v2926_v17  }
 0x137   : > { %v765_v55 = vpop.permute.xlu1 %764 }
 0x138   : > { %vm806_vm5 = vcmp.eq.s32.totalorder %v765_v55, %v3002_v32 }
 0x139   : > { %vm2297_vm7 = vmpackc.low %vm806_vm5, %vm805_vm4  ;;  %2762 = vset.pattern.permute.xlu1 %v2803_v53  ;;  %v3449_v58 = vpop.f32.mrf.mxu3 }
 0x13a   : > { %1311 = vperm.xlu1 %2762, %v2908_v14   ;;  %v3452_v59 = vpop.f32.mrf.mxu1  ;;  %2298 = vmatmul.msk.bf16.gmra.mxu2 %vm2297_vm7, %v2802_v36  ;;  %vm2382_vm4 = vmpackc.low %vm1070_vm2, %vm1069_vm1  ;;  %vm807_vm7 = vcmp.eq.s32.totalorder %v3416_v45, %v3002_v32 }
 0x13b   : > { %2763 = vset.pattern.permute.xlu2 %v2803_v53  ;;  %v1294_v17 = vpop.permute.xlu2 %1293 }
 0x13c   : > { %1314 = vperm.xlu2 %2763, %v2905_v13  }
 0x13d   : > { %v3463_v60 = vpop.f32.mrf.mxu0 }
 0x13f   : > { %2381 = vmatmul.msk.bf16.gmra.mxu3 %vm2380_vm13, %v2802_v36  ;;  %vm1337_vm13 = vcmp.eq.s32.totalorder %v1294_v17, %v3002_v32 }
 0x140   : > { %v1554_v52 = vpop.permute.xlu1 %1553  ;;  %2470 = vmatmul.msk.bf16.gmra.mxu0 %vm2469_vm8, %v2802_v36 }
 0x141   : > { %vm1601_vm15 = vcmp.eq.s32.totalorder %v1554_v52, %v3002_v32  ;;  %v602_v61 = vpop.f32.mrf.mxu3 }
 0x142   : > { %vm2556_vm0 = vmpackc.low %vm1602_vm14, %vm1601_vm15  ;;  %2764 = vset.pattern.permute.xlu1 %v2804_v57  ;;  %v3470_v62 = vpop.f32.mrf.mxu1  ;;  %v3473_v63 = vadd.f32 %v3392_v4, %v602_v61  ;;  %v2660_v4 = vld [vmem:[%s3815_s3 + $0x30] sm:$0xff] }
 0x143   : > { %1577 = vperm.xlu1 %2764, %v2908_v14   ;;  %2557 = vmatmul.msk.bf16.gmra.mxu1 %vm2556_vm0, %v2802_v36 }
 0x144   : > { %2765 = vset.pattern.permute.xlu2 %v2804_v57 }
 0x145   : > { %v3478_v0 = vpop.f32.mrf.mxu0  ;;  %1580 = vperm.xlu2 %2765, %v2905_v13   ;;  %v1560_v3 = vpop.permute.xlu2 %1559 }
 0x146   : > { %vm1603_vm3 = vcmp.eq.s32.totalorder %v1560_v3, %v3002_v32  ;;  %v1572_v3 = vpop.permute.xlu0 %1571 }
 0x147   : > { %vm2558_vm5 = vmpackc.low %vm1604_vm6, %vm1603_vm3 }
 0x149   : > { %v1028_v8 = vpop.permute.xlu1 %1027  ;;  %v3481_v16 = vpop.f32.mrf.mxu3 }
 0x14a   : > { %v3483_v9 = vpop.f32.mrf.mxu1  ;;  %vm1071_vm12 = vcmp.eq.s32.totalorder %v1028_v8, %v3002_v32 }
 0x14b   : > { %2767 = vset.pattern.permute.xlu1 %v2800_v29  ;;  %vm2384_vm15 = vmpackc.low %vm1072_vm11, %vm1071_vm12  ;;  %vm1076_vm11 = vcmp.eq.s32.totalorder %v1043_v10, %v3002_v32 }
 0x14c   : > { %1054 = vperm.xlu1 %2767, %v2988_v26  }
 0x14d   : > { %v3491_v14 = vpop.f32.mrf.mxu0  ;;  %2768 = vset.pattern.permute.xlu2 %v2801_v31 }
 0x14e   : > { %791 = vperm.xlu2 %2768, %v2985_v25   ;;  %v1037_v13 = vpop.permute.xlu2 %1036 }
 0x14f   : > { %2383 = vmatmul.msk.bf16.gmra.mxu3 %vm2382_vm4, %v2802_v36  ;;  %vm1074_vm0 = vcmp.eq.s32.totalorder %v1037_v13, %v3002_v32 }
 0x152   : > { %v607_v6 = vpop.f32.mrf.mxu3  ;;  %v771_v15 = vpop.permute.xlu1 %770 }
 0x153   : > { %v3500_v18 = vadd.f32 %v3413_v43, %v607_v6  ;;  %vm808_vm9 = vcmp.eq.s32.totalorder %v771_v15, %v3002_v32  ;;  %2559 = vmatmul.msk.bf16.gmra.mxu1 %vm2558_vm5, %v2802_v36  ;;  %v3504_v50 = vpop.f32.mrf.mxu1  ;;  %vm1339_vm5 = vcmp.eq.s32.totalorder %v1300_v7, %v3002_v32 }
 0x154   : > { %vm2299_vm10 = vmpackc.low %vm808_vm9, %vm807_vm7  ;;  %2769 = vset.pattern.permute.xlu1 %v2801_v31  ;;  %v2661_v31 = vld [vmem:[%s3815_s3 + $0x38] sm:$0xff] }
 0x155   : > { %794 = vperm.xlu1 %2769, %v2995_v28   ;;  %v3508_v25 = vpop.f32.mrf.mxu0  ;;  %2300 = vmatmul.msk.bf16.gmra.mxu2 %vm2299_vm10, %v2802_v36 }
 0x156   : > { %2770 = vset.pattern.permute.xlu2 %v2803_v53  ;;  %1926 = vmatpush.bf16.msrb.mxu2 %v2661_v31 }
 0x157   : > { %1317 = vperm.xlu2 %2770, %v2786_v5   ;;  %v777_v19 = vpop.permute.xlu2 %776 }
 0x158   : > { %vm810_vm2 = vcmp.eq.s32.totalorder %v777_v19, %v3002_v32 }
 0x15a   : > { %v3513_v2 = vpop.f32.mrf.mxu3  ;;  %1927 = vmatpush.bf16.msrb.mxu2 %v2660_v4 }
 0x15b   : > { %v1297_v40 = vpop.permute.xlu1 %1296  ;;  %v3524_v21 = vpop.f32.mrf.mxu1 }
 0x15c   : > { %vm1338_vm8 = vcmp.eq.s32.totalorder %v1297_v40, %v3002_v32 }
 0x15d   : > { %vm2471_vm14 = vmpackc.low %vm1338_vm8, %vm1337_vm13  ;;  %2772 = vset.pattern.permute.xlu1 %v2804_v57  ;;  %v693_v20 = vpop.f32.mrf.mxu0 }
 0x15e   : > { %v3527_v22 = vadd.f32 %v693_v20, %v3463_v60  ;;  %1583 = vperm.xlu1 %2772, %v2786_v5   ;;  %2472 = vmatmul.msk.bf16.gmra.mxu0 %vm2471_vm14, %v2802_v36  ;;  %v2789_v60 = vld [vmem:[%s2854_s24 + $0x90] sm:$0xff] }
 0x15f   : > { %2385 = vmatmul.msk.bf16.gmra.mxu3 %vm2384_vm15, %v2802_v36  ;;  %2773 = vset.pattern.permute.xlu2 %v2804_v57 }
 0x160   : > { %1586 = vperm.xlu2 %2773, %v2988_v26   ;;  %v1566_v23 = vpop.permute.xlu2 %1565 }
 0x161   : > { %vm1605_vm13 = vcmp.eq.s32.totalorder %v1566_v23, %v3002_v32 }
 0x162   : > { %v612_v27 = vpop.f32.mrf.mxu3 }
 0x163   : > { %v3534_v24 = vadd.f32 %v3439_v51, %v612_v27  ;;  %v2659_v51 = vld [vmem:[%s3815_s3 + $0x28] sm:$0xff] }
 0x164   : > { %v1034_v30 = vpop.permute.xlu1 %1033  ;;  %1928 = vmatpush.bf16.msrb.mxu2 %v2659_v51 }
 0x165   : > { %v3536_v33 = vpop.f32.mrf.mxu0  ;;  %vm1073_vm1 = vcmp.eq.s32.totalorder %v1034_v30, %v3002_v32  ;;  %v2657_v30 = vld [vmem:[%s3815_s3 + $0x18] sm:$0xff] }
 0x166   : > { %2774 = vset.pattern.permute.xlu1 %v2800_v29  ;;  %vm2386_vm6 = vmpackc.low %vm1074_vm0, %vm1073_vm1 }
 0x167   : > { %v3539_v34 = vpop.f32.mrf.mxu1  ;;  %1057 = vperm.xlu1 %2774, %v2787_v37  }
 0x168   : > { %2775 = vset.pattern.permute.xlu2 %v2800_v29 }
 0x169   : > { %1060 = vperm.xlu2 %2775, %v2995_v28   ;;  %v1040_v38 = vpop.permute.xlu2 %1039 }
 0x16a   : > { %v3544_v26 = vpop.f32.mrf.mxu3  ;;  %vm1075_vm10 = vcmp.eq.s32.totalorder %v1040_v38, %v3002_v32 }
 0x16b   : > { %vm2388_vm12 = vmpackc.low %vm1076_vm11, %vm1075_vm10 }
 0x16d   : > { %v774_v39 = vpop.permute.xlu1 %773  ;;  %v698_v12 = vpop.f32.mrf.mxu0 }
 0x16e   : > { %vm809_vm3 = vcmp.eq.s32.totalorder %v774_v39, %v3002_v32  ;;  %v3554_v28 = vadd.f32 %v698_v12, %v3491_v14  ;;  %v2658_v14 = vld [vmem:[%s3815_s3 + $0x20] sm:$0xff] }
 0x16f   : > { %vm2301_vm4 = vmpackc.low %vm810_vm2, %vm809_vm3  ;;  %2387 = vmatmul.msk.bf16.gmra.mxu3 %vm2386_vm6, %v2802_v36  ;;  %2777 = vset.pattern.permute.xlu1 %v2803_v53  ;;  %v3558_v29 = vpop.f32.mrf.mxu1 }
 0x170   : > { %1323 = vperm.xlu1 %2777, %v2787_v37   ;;  %2302 = vmatmul.msk.bf16.gmra.mxu2 %vm2301_vm4, %v2802_v36 }
 0x171   : > { %2778 = vset.pattern.permute.xlu2 %v2803_v53  ;;  %1929 = vmatpush.bf16.msrb.mxu2 %v2658_v14 }
 0x172   : > { %v617_v41 = vpop.f32.mrf.mxu3  ;;  %1326 = vperm.xlu2 %2778, %v2788_v42   ;;  %v783_v43 = vpop.permute.xlu2 %782 }
 0x173   : > { %v3564_v44 = vadd.f32 %v3470_v62, %v617_v41  ;;  %vm812_vm15 = vcmp.eq.s32.totalorder %v783_v43, %v3002_v32  ;;  %v2656_v43 = vld [vmem:[%s3815_s3 + $0x10] sm:$0xff] }
 0x175   : > { %v3567_v45 = vpop.f32.mrf.mxu0  ;;  %1930 = vmatpush.bf16.msrb.mxu2 %v2657_v30  ;;  %v696_v30 = vadd.f32 %v3536_v33, %v3478_v0  ;;  %v706_v33 = vadd.f32 %v3372_v35, %v3449_v58 }
 0x176   : > { %v1303_v46 = vpop.permute.xlu1 %1302 }
 0x177   : > { %vm1340_vm7 = vcmp.eq.s32.totalorder %v1303_v46, %v3002_v32 }
 0x178   : > { %vm2473_vm9 = vmpackc.low %vm1340_vm7, %vm1339_vm5  ;;  %2779 = vset.pattern.permute.xlu1 %v2804_v57  ;;  %v3571_v47 = vpop.f32.mrf.mxu1 }
 0x179   : > { %1589 = vperm.xlu1 %2779, %v2787_v37   ;;  %2474 = vmatmul.msk.bf16.gmra.mxu0 %vm2473_vm9, %v2802_v36  ;;  %vm1607_vm9 = vcmp.eq.s32.totalorder %v1572_v3, %v3002_v32 }
 0x17a   : > { %v3576_v48 = vpop.f32.mrf.mxu3  ;;  %2780 = vset.pattern.permute.xlu2 %v2804_v57  ;;  %1931 = vmatpush.bf16.msrb.mxu2 %v2656_v43 }
 0x17b   : > { %1592 = vperm.xlu2 %2780, %v2788_v42   ;;  %v1309_v49 = vpop.permute.xlu2 %1308 }
 0x17c   : > { %vm1342_vm2 = vcmp.eq.s32.totalorder %v1309_v49, %v3002_v32 }
 0x17d   : > { %v3582_v55 = vpop.f32.mrf.mxu0 }
 0x17e   : > { %v989_v43 = vadd.f32 %v3582_v55, %v3527_v22 }
 0x17f   : > { %2389 = vmatmul.msk.bf16.gmra.mxu3 %vm2388_vm12, %v2802_v36  ;;  %v1569_v56 = vpop.permute.xlu1 %1568 }
 0x180   : > { %vm1606_vm8 = vcmp.eq.s32.totalorder %v1569_v56, %v3002_v32  ;;  %v740_v17 = vpop.f32.mrf.mxu1 }
 0x181   : > { %vm2560_vm14 = vmpackc.low %vm1606_vm8, %vm1605_vm13  ;;  %2782 = vset.pattern.permute.xlu1 %v2803_v53 }
 0x182   : > { %v622_v57 = vpop.f32.mrf.mxu3  ;;  %1329 = vperm.xlu1 %2782, %v2789_v60   ;;  %2561 = vmatmul.msk.bf16.gmra.mxu1 %vm2560_vm14, %v2802_v36 }
 0x183   : > { %v3591_v52 = vadd.f32 %v3504_v50, %v622_v57  ;;  %1595 = vperm.xlu2 %2780, %v2789_v60   ;;  %v789_v50 = vpop.permute.xlu0 %788 }
 0x184   : > { %v1046_v61 = vpop.permute.xlu2 %1045  ;;  %vm814_vm5 = vcmp.eq.s32.totalorder %v789_v50, %v3002_v32 }
 0x185   : > { %v3594_v8 = vpop.f32.mrf.mxu0  ;;  %vm1077_vm12 = vcmp.eq.s32.totalorder %v1046_v61, %v3002_v32  ;;  %v2655_v61 = vld [vmem:[%s3815_s3 + $0x8] sm:$0xff] }
 0x186   : > { %1932 = vmatpush.bf16.msrb.mxu2 %v2655_v61 }
 0x188   : > { %v780_v62 = vpop.permute.xlu1 %779 }
 0x189   : > { %vm811_vm0 = vcmp.eq.s32.totalorder %v780_v62, %v3002_v32 }
 0x18a   : > { %vm2303_vm1 = vmpackc.low %vm812_vm15, %vm811_vm0  ;;  %v3597_v53 = vpop.f32.mrf.mxu3  ;;  %v3635_v42 = vpop.f32.mrf.mxu1 }
 0x18b   : > { %2304 = vmatmul.msk.bf16.gmra.mxu2 %vm2303_vm1, %v2802_v36  ;;  %v1052_v12 = vpop.permute.xlu0 %1051 }
 0x18d   : > { %v786_v13 = vpop.permute.xlu2 %785  ;;  %v3605_v5 = vpop.f32.mrf.mxu0 }
 0x18e   : > { %vm813_vm4 = vcmp.eq.s32.totalorder %v786_v13, %v3002_v32  ;;  %v2654_v13 = vld [vmem:[%s3815_s3] sm:$0xff] }
 0x18f   : > { %vm2305_vm7 = vmpackc.low %vm814_vm5, %vm813_vm4  ;;  %1933 = vmatpush.bf16.msrb.mxu2 %v2654_v13 }
 0x191   : > { %v1306_v6 = vpop.permute.xlu1 %1305 }
 0x192   : > { %vm1341_vm6 = vcmp.eq.s32.totalorder %v1306_v6, %v3002_v32  ;;  %v627_v15 = vpop.f32.mrf.mxu3  ;;  %v3643_v56 = vpop.f32.mrf.mxu1 }
 0x193   : > { %vm2475_vm3 = vmpackc.low %vm1342_vm2, %vm1341_vm6  ;;  %v3608_v19 = vadd.f32 %v3539_v34, %v627_v15  ;;  %v1321_v51 = vpop.permute.xlu0 %1320  ;;  %v950_v15 = vpop.f32.mrf.mxu2 }
 0x194   : > { %2476 = vmatmul.msk.bf16.gmra.mxu0 %vm2475_vm3, %v2802_v36  ;;  %vm1346_vm4 = vcmp.eq.s32.totalorder %v1321_v51, %v3002_v32 }
 0x195   : > { %v3619_v27 = vpop.f32.mrf.mxu0 }
 0x196   : > { %v1315_v40 = vpop.permute.xlu2 %1314 }
 0x197   : > { %vm1344_vm14 = vcmp.eq.s32.totalorder %v1315_v40, %v3002_v32 }
 0x19a   : > { %v629_v31 = vpop.f32.mrf.mxu3  ;;  %v1575_v20 = vpop.permute.xlu1 %1574 }
 0x19b   : > { %v3615_v23 = vadd.f32 %v3558_v29, %v629_v31  ;;  %vm1608_vm10 = vcmp.eq.s32.totalorder %v1575_v20, %v3002_v32  ;;  %2306 = vmatmul.msk.bf16.gmra.mxu2 %vm2305_vm7, %v2802_v36  ;;  %vm1079_vm7 = vcmp.eq.s32.totalorder %v1052_v12, %v3002_v32 }
 0x19c   : > { %vm2562_vm11 = vmpackc.low %vm1608_vm10, %vm1607_vm9 }
 0x19d   : > { %2563 = vmatmul.msk.bf16.gmra.mxu1 %vm2562_vm11, %v2802_v36  ;;  %v3631_v4 = vpop.f32.mrf.mxu0 }
 0x19f   : > { %v1581_v37 = vpop.permute.xlu2 %1580 }
 0x1a0   : > { %vm1610_vm1 = vcmp.eq.s32.totalorder %v1581_v37, %v3002_v32  ;;  %v993_v37 = vadd.f32 %v950_v15, %v3443_v54  ;;  %v3694_v15 = vld [vmem:[%s3814_s2] ss:$0 sm:$0xff] }
 0x1a2   : > { %v632_v34 = vpop.f32.mrf.mxu3 }
 0x1a3   : > { %v3626_v38 = vadd.f32 %v3571_v47, %v632_v34  ;;  %v1049_v7 = vpop.permute.xlu1 %1048 }
 0x1a4   : > { %vm1078_vm13 = vcmp.eq.s32.totalorder %v1049_v7, %v3002_v32  ;;  %v798_v7 = vpop.permute.xlu0 %797 }
 0x1a5   : > { %vm2390_vm8 = vmpackc.low %vm1078_vm13, %vm1077_vm12  ;;  %v1474_v46 = vpop.f32.mrf.mxu0  ;;  %v3656_v62 = vpop.f32.mrf.mxu1 }
 0x1a6   : > { %2391 = vmatmul.msk.bf16.gmra.mxu3 %vm2390_vm8, %v2802_v36 }
 0x1a8   : > { %v792_v41 = vpop.permute.xlu2 %791 }
 0x1a9   : > { %vm815_vm11 = vcmp.eq.s32.totalorder %v792_v41, %v3002_v32 }
 0x1aa   : > { %v634_v39 = vpop.f32.mrf.mxu3 }
 0x1ab   : > { %v990_v39 = vadd.f32 %v3594_v8, %v696_v30 }
 0x1ac   : > { %v1312_v29 = vpop.permute.xlu1 %1311 }
 0x1ad   : > { %vm1343_vm15 = vcmp.eq.s32.totalorder %v1312_v29, %v3002_v32  ;;  %v3648_v57 = vpop.f32.mrf.mxu0  ;;  %v3668_v50 = vpop.f32.mrf.mxu1 }
 0x1ae   : > { %vm2477_vm0 = vmpackc.low %vm1344_vm14, %vm1343_vm15 }
 0x1af   : > { %2478 = vmatmul.msk.bf16.gmra.mxu0 %vm2477_vm0, %v2802_v36  ;;  %vm817_vm0 = vcmp.eq.s32.totalorder %v798_v7, %v3002_v32 }
 0x1b1   : > { %v1318_v49 = vpop.permute.xlu2 %1317 }
 0x1b2   : > { %v1206_v10 = vpop.f32.mrf.mxu3  ;;  %vm1345_vm3 = vcmp.eq.s32.totalorder %v1318_v49, %v3002_v32 }
 0x1b3   : > { %vm2479_vm5 = vmpackc.low %vm1346_vm4, %vm1345_vm3  ;;  %v1255_v54 = vadd.f32 %v1206_v10, %v989_v43 }
 0x1b5   : > { %v1578_v47 = vpop.permute.xlu1 %1577  ;;  %v3661_v14 = vpop.f32.mrf.mxu0 }
 0x1b6   : > { %vm1609_vm2 = vcmp.eq.s32.totalorder %v1578_v47, %v3002_v32  ;;  %v952_v47 = vpop.f32.mrf.mxu2 }
 0x1b7   : > { %vm2564_vm6 = vmpackc.low %vm1610_vm1, %vm1609_vm2 }
 0x1b8   : > { %2565 = vmatmul.msk.bf16.gmra.mxu1 %vm2564_vm6, %v2802_v36  ;;  %vm2309_vm1 = vmpackc.low %vm817_vm0, %vm817_vm0 }
 0x1ba   : > { %v1208_v17 = vpop.f32.mrf.mxu3  ;;  %v1587_v31 = vpop.permute.xlu2 %1586 }
 0x1bb   : > { %vm1612_vm8 = vcmp.eq.s32.totalorder %v1587_v31, %v3002_v32  ;;  %v1256_v49 = vadd.f32 %v1208_v17, %v990_v39 }
 0x1bd   : > { %v1482_v20 = vpop.f32.mrf.mxu0  ;;  %v1522_v8 = vadd.f32 %v1474_v46, %v1256_v49 }
 0x1be   : > { %v1055_v60 = vpop.permute.xlu1 %1054  ;;  %v955_v58 = vpop.f32.mrf.mxu2 }
 0x1bf   : > { %vm1080_vm9 = vcmp.eq.s32.totalorder %v1055_v60, %v3002_v32  ;;  %2480 = vmatmul.msk.bf16.gmra.mxu0 %vm2479_vm5, %v2802_v36  ;;  %v994_v60 = vadd.f32 %v952_v47, %v706_v33  ;;  %v1788_v35 = vadd.f32 %v3643_v56, %v1522_v8  ;;  %v1064_v47 = vpop.permute.xlu0 %1063 }
 0x1c0   : > { %vm2392_vm10 = vmpackc.low %vm1080_vm9, %vm1079_vm7  ;;  %v1748_v12 = vpop.f32.mrf.mxu1  ;;  %vm1083_vm9 = vcmp.eq.s32.totalorder %v1064_v47, %v3002_v32  ;;  %v716_v47 = vadd.f32 %v3423_v11, %v3513_v2 }
 0x1c1   : > { %2393 = vmatmul.msk.bf16.gmra.mxu3 %vm2392_vm10, %v2802_v36  ;;  %v1811_v56 = vadd.f32 %v3694_v15, %v1788_v35  ;;  %vm2396_vm10 = vmpackc.low %vm1083_vm9, %vm1083_vm9 }
 0x1c2   : > { %v3659_v3 = vpop.f32.mrf.mxu3 }
 0x1c3   : > { %v1061_v0 = vpop.permute.xlu2 %1060 }
 0x1c4   : > { %vm1082_vm2 = vcmp.eq.s32.totalorder %v1061_v0, %v3002_v32 }
 0x1c5   : > { %v1484_v61 = vpop.f32.mrf.mxu0 }
 0x1c7   : > { %v795_v6 = vpop.permute.xlu1 %794 }
 0x1c8   : > { %vm816_vm12 = vcmp.eq.s32.totalorder %v795_v6, %v3002_v32  ;;  %v1521_v6 = vadd.f32 %v3631_v4, %v1255_v54  ;;  %v1750_v17 = vpop.f32.mrf.mxu1 }
 0x1c9   : > { %vm2307_vm13 = vmpackc.low %vm816_vm12, %vm815_vm11 }
 0x1ca   : > { %v3670_v40 = vpop.f32.mrf.mxu3  ;;  %2308 = vmatmul.msk.bf16.gmra.mxu2 %vm2307_vm13, %v2802_v36  ;;  %v1787_v4 = vadd.f32 %v3635_v42, %v1521_v6 }
 0x1d0   : > { %v1584_v34 = vpop.permute.xlu1 %1583  ;;  %v1753_v0 = vpop.f32.mrf.mxu1 }
 0x1d1   : > { %vm1611_vm14 = vcmp.eq.s32.totalorder %v1584_v34, %v3002_v32  ;;  %v701_v34 = vadd.f32 %v3567_v45, %v3508_v25 }
 0x1d2   : > { %vm2566_vm15 = vmpackc.low %vm1612_vm8, %vm1611_vm14  ;;  %v1216_v29 = vpop.f32.mrf.mxu3 }
 0x1d3   : > { %v1259_v41 = vadd.f32 %v1216_v29, %v993_v37  ;;  %2567 = vmatmul.msk.bf16.gmra.mxu1 %vm2566_vm15, %v2802_v36  ;;  %v995_v37 = vadd.f32 %v955_v58, %v3473_v63  ;;  %v991_v63 = vadd.f32 %v3605_v5, %v3554_v28 }
 0x1d5   : > { %v1525_v51 = vadd.f32 %v1482_v20, %v1259_v41  ;;  %v1327_v20 = vpop.permute.xlu2 %1326  ;;  %v1810_v41 = vadd.f32 %v3694_v15, %v1787_v4  ;;  %v1257_v33 = vadd.f32 %v3659_v3, %v991_v63 }
 0x1d6   : > { %vm1348_vm4 = vcmp.eq.s32.totalorder %v1327_v20, %v3002_v32 }
 0x1d7   : > { %v1791_v55 = vadd.f32 %v1748_v12, %v1525_v51  ;;  %v992_v12 = vadd.f32 %v3619_v27, %v701_v34  ;;  %v1830_v27 = vmax.f32 %v1811_v56, 0.0  ;;  %v957_v51 = vpop.f32.mrf.mxu2  ;;  %v1829_v8 = vmax.f32 %v1810_v41, 0.0 }
 0x1d8   : > { %v1523_v6 = vadd.f32 %v3648_v57, %v1257_v33 }
 0x1d9   : > { %v1058_v13 = vpop.permute.xlu1 %1057  ;;  %v1814_v30 = vadd.f32 %v3694_v15, %v1791_v55  ;;  %v1258_v49 = vadd.f32 %v3670_v40, %v992_v12  ;;  %v1848_v40 = vpack.c.bf16 %v1830_v27, %v1829_v8 }
 0x1da   : > { %vm1081_vm6 = vcmp.eq.s32.totalorder %v1058_v13, %v3002_v32  ;;  %v1218_v22 = vpop.f32.mrf.mxu3  ;;  %2310 = vmatmul.msk.bf16.gmra.mxu2 %vm2309_vm1, %v2802_v36 }
 0x1db   : > { %vm2394_vm3 = vmpackc.low %vm1082_vm2, %vm1081_vm6  ;;  %v1260_v10 = vadd.f32 %v1218_v22, %v994_v60  ;;  %v1487_v7 = vpop.f32.mrf.mxu0  ;;  %v1833_v25 = vmax.f32 %v1814_v30, 0.0  ;;  %v711_v60 = vadd.f32 %v3400_v1, %v3481_v16  ;;  %v1524_v5 = vadd.f32 %v3661_v14, %v1258_v49  ;;  %v1755_v14 = vpop.f32.mrf.mxu1 }
 0x1dc   : > { %2395 = vmatmul.msk.bf16.gmra.mxu3 %vm2394_vm3, %v2802_v36  ;;  %v1789_v16 = vadd.f32 %v3656_v62, %v1523_v6 }
 0x1dd   : > { %v1526_v46 = vadd.f32 %v1484_v61, %v1260_v10  ;;  %v996_v61 = vadd.f32 %v957_v51, %v711_v60  ;;  %v1593_v13 = vpop.permute.xlu2 %1592  ;;  %v1790_v35 = vadd.f32 %v3668_v50, %v1524_v5 }
 0x1de   : > { %vm1614_vm11 = vcmp.eq.s32.totalorder %v1593_v13, %v3002_v32  ;;  %v1812_v50 = vadd.f32 %v3694_v15, %v1789_v16 }
 0x1df   : > { %v1792_v31 = vadd.f32 %v1750_v17, %v1526_v46  ;;  %v1813_v46 = vadd.f32 %v3694_v15, %v1790_v35 }
 0x1e0   : > { %v1831_v62 = vmax.f32 %v1812_v50, 0.0 }
 0x1e1   : > { %v1815_v39 = vadd.f32 %v3694_v15, %v1792_v31  ;;  %v1832_v34 = vmax.f32 %v1813_v46, 0.0 }
 0x1e2   : > { %v1221_v29 = vpop.f32.mrf.mxu3  ;;  %v1324_v42 = vpop.permute.xlu1 %1323 }
 0x1e3   : > { %v1261_v43 = vadd.f32 %v1221_v29, %v995_v37  ;;  %vm1347_vm5 = vcmp.eq.s32.totalorder %v1324_v42, %v3002_v32  ;;  %v1834_v45 = vmax.f32 %v1815_v39, 0.0  ;;  %v1489_v58 = vpop.f32.mrf.mxu0  ;;  %v960_v39 = vpop.f32.mrf.mxu2 }
 0x1e4   : > { %vm2481_vm7 = vmpackc.low %vm1348_vm4, %vm1347_vm5 }
 0x1e5   : > { %2482 = vmatmul.msk.bf16.gmra.mxu0 %vm2481_vm7, %v2802_v36  ;;  %v1850_v54 = vpack.c.bf16 %v1834_v45, %v1833_v25  ;;  %v1527_v28 = vadd.f32 %v1487_v7, %v1261_v43  ;;  %v1596_v37 = vpop.permute.xlu2 %1595  ;;  %v1849_v7 = vpack.c.bf16 %v1832_v34, %v1831_v62 }
 0x1e6   : > { %vm1615_vm15 = vcmp.eq.s32.totalorder %v1596_v37, %v3002_v32 }
 0x1e7   : > { %v1793_v3 = vadd.f32 %v1753_v0, %v1527_v28  ;;  %vm2570_vm0 = vmpackc.low %vm1615_vm15, %vm1615_vm15 }
 0x1e9   : > { %v1816_v17 = vadd.f32 %v3694_v15, %v1793_v3 }
 0x1ea   : > { %v1223_v22 = vpop.f32.mrf.mxu3  ;;  %1934 = vmatmul.bf16.vlgmr.msrb.gmra.mxu2 %v1848_v40 }
 0x1eb   : > { %v1262_v55 = vadd.f32 %v1223_v22, %v996_v61  ;;  %v1590_v10 = vpop.permute.xlu1 %1589  ;;  %v1835_v31 = vmax.f32 %v1816_v17, 0.0  ;;  %v962_v42 = vpop.f32.mrf.mxu2  ;;  %v721_v61 = vadd.f32 %v3452_v59, %v3544_v26 }
 0x1ec   : > { %vm1613_vm12 = vcmp.eq.s32.totalorder %v1590_v10, %v3002_v32  ;;  %2397 = vmatmul.msk.bf16.gmra.mxu3 %vm2396_vm10, %v2802_v36  ;;  %v998_v63 = vadd.f32 %v962_v42, %v716_v47 }
 0x1ed   : > { %v1528_v1 = vadd.f32 %v1489_v58, %v1262_v55  ;;  %vm2568_vm13 = vmpackc.low %vm1614_vm11, %vm1613_vm12 }
 0x1ee   : > { %2569 = vmatmul.msk.bf16.gmra.mxu1 %vm2568_vm13, %v2802_v36 }
 0x1ef   : > { %v1794_v57 = vadd.f32 %v1755_v14, %v1528_v1 }
 0x1f1   : > { %v1817_v4 = vadd.f32 %v3694_v15, %v1794_v57 }
 0x1f2   : > { %v1226_v12 = vpop.f32.mrf.mxu3 }
 0x1f3   : > { %v1836_v20 = vmax.f32 %v1817_v4, 0.0  ;;  %v965_v25 = vpop.f32.mrf.mxu2 }
 0x1f4   : > { %v1330_v30 = vpop.permute.xlu1 %1329  ;;  %v999_v55 = vadd.f32 %v965_v25, %v3534_v24 }
 0x1f5   : > { %vm1349_vm8 = vcmp.eq.s32.totalorder %v1330_v30, %v3002_v32  ;;  %v1851_v56 = vpack.c.bf16 %v1836_v20, %v1835_v31  ;;  %v997_v32 = vadd.f32 %v960_v39, %v3500_v18  ;;  %v726_v31 = vadd.f32 %v3483_v9, %v3576_v48 }
 0x1f6   : > { %vm2483_vm14 = vmpackc.low %vm1349_vm8, %vm1349_vm8  ;;  %v1492_v29 = vpop.f32.mrf.mxu0 }
 0x1f7   : > { %2484 = vmatmul.msk.bf16.gmra.mxu0 %vm2483_vm14, %v2802_v36  ;;  %v1263_v33 = vadd.f32 %v1226_v12, %v997_v32 }
 0x1f9   : > { %v1529_v51 = vadd.f32 %v1492_v29, %v1263_v33 }
 0x1fa   : > { %1939 = vmatmul.bf16.gmra.mxu2 %v1849_v7  ;;  %v1228_v43 = vpop.f32.mrf.mxu3 }
 0x1fb   : > { %v1264_v0 = vadd.f32 %v1228_v43, %v998_v63  ;;  %v967_v28 = vpop.f32.mrf.mxu2 }
 0x1fc   : > { %v1000_v13 = vadd.f32 %v967_v28, %v721_v61 }
 0x1fe   : > { %2571 = vmatmul.msk.bf16.gmra.mxu1 %vm2570_vm0, %v2802_v36  ;;  %v1494_v45 = vpop.f32.mrf.mxu0 }
 0x1ff   : > { %v1758_v41 = vpop.f32.mrf.mxu1  ;;  %v1530_v36 = vadd.f32 %v1494_v45, %v1264_v0 }
 0x200   : > { %v1795_v60 = vadd.f32 %v1758_v41, %v1529_v51 }
 0x202   : > { %v1231_v27 = vpop.f32.mrf.mxu3  ;;  %v1818_v11 = vadd.f32 %v3694_v15, %v1795_v60 }
 0x203   : > { %v1265_v1 = vadd.f32 %v1231_v27, %v999_v55 }
 0x204   : > { %v1837_v6 = vmax.f32 %v1818_v11, 0.0 }
 0x207   : > { %v1760_v49 = vpop.f32.mrf.mxu1 }
 0x20a   : > { %1944 = vmatmul.bf16.gmra.mxu2 %v1850_v54  ;;  %v1796_v54 = vadd.f32 %v1760_v49, %v1530_v36  ;;  %v1233_v2 = vpop.f32.mrf.mxu3  ;;  %v731_v36 = vadd.f32 %v3524_v21, %v3597_v53 }
 0x20b   : > { %v1266_v10 = vadd.f32 %v1233_v2, %v1000_v13 }
 0x20c   : > { %v1819_v40 = vadd.f32 %v3694_v15, %v1796_v54 }
 0x20e   : > { %v1838_v18 = vmax.f32 %v1819_v40, 0.0  ;;  %v970_v22 = vpop.f32.mrf.mxu2 }
 0x20f   : > { %v1001_v34 = vadd.f32 %v970_v22, %v3564_v44 }
 0x210   : > { %v1852_v35 = vpack.c.bf16 %v1838_v18, %v1837_v6 }
 0x211   : > { %v1497_v8 = vpop.f32.mrf.mxu0 }
 0x212   : > { %v1531_v57 = vadd.f32 %v1497_v8, %v1265_v1 }
 0x216   : > { %v972_v26 = vpop.f32.mrf.mxu2 }
 0x219   : > { %v1499_v3 = vpop.f32.mrf.mxu0 }
 0x21a   : > { %1949 = vmatmul.bf16.gmra.mxu2 %v1851_v56  ;;  %v1763_v5 = vpop.f32.mrf.mxu1  ;;  %v1532_v16 = vadd.f32 %v1499_v3, %v1266_v10  ;;  %v1002_v56 = vadd.f32 %v972_v26, %v726_v31 }
 0x21b   : > { %v1797_v46 = vadd.f32 %v1763_v5, %v1531_v57 }
 0x21d   : > { %v1820_v50 = vadd.f32 %v3694_v15, %v1797_v46 }
 0x21e   : > { %v975_v29 = vpop.f32.mrf.mxu2 }
 0x21f   : > { %v1839_v62 = vmax.f32 %v1820_v50, 0.0  ;;  %v1003_v27 = vadd.f32 %v975_v29, %v3591_v52 }
 0x222   : > { %v1765_v58 = vpop.f32.mrf.mxu1 }
 0x223   : > { %v1798_v17 = vadd.f32 %v1765_v58, %v1532_v16 }
 0x225   : > { %v1821_v59 = vadd.f32 %v3694_v15, %v1798_v17 }
 0x226   : > { %v977_v63 = vpop.f32.mrf.mxu2 }
 0x227   : > { %v1840_v24 = vmax.f32 %v1821_v59, 0.0  ;;  %v1004_v60 = vadd.f32 %v977_v63, %v731_v36 }
 0x229   : > { %v1236_v14 = vpop.f32.mrf.mxu3  ;;  %v1853_v39 = vpack.c.bf16 %v1840_v24, %v1839_v62 }
 0x22a   : > { %1954 = vmatmul.bf16.gmra.mxu2 %v1852_v35  ;;  %v1267_v37 = vadd.f32 %v1236_v14, %v1001_v34  ;;  %v3757_v14 = vld [vmem:[%s3816_s4] ss:$0 sm:$0xff] }
 0x22c   : > { %v1502_v4 = vpop.f32.mrf.mxu0 }
 0x22d   : > { %v1533_v42 = vadd.f32 %v1502_v4, %v1267_v37 }
 0x231   : > { %v1238_v20 = vpop.f32.mrf.mxu3 }
 0x232   : > { %v1268_v7 = vadd.f32 %v1238_v20, %v1002_v56 }
 0x234   : > { %v1504_v12 = vpop.f32.mrf.mxu0 }
 0x235   : > { %v1768_v30 = vpop.f32.mrf.mxu1  ;;  %v1534_v41 = vadd.f32 %v1504_v12, %v1268_v7 }
 0x236   : > { %v1799_v47 = vadd.f32 %v1768_v30, %v1533_v42 }
 0x238   : > { %v1822_v48 = vadd.f32 %v3694_v15, %v1799_v47 }
 0x23a   : > { %1959 = vmatmul.bf16.gmra.mxu2 %v1853_v39  ;;  %v1841_v44 = vmax.f32 %v1822_v48, 0.0 }
 0x23c   : > { %v1507_v0 = vpop.f32.mrf.mxu0 }
 0x23d   : > { %v1770_v43 = vpop.f32.mrf.mxu1 }
 0x23e   : > { %v1800_v25 = vadd.f32 %v1770_v43, %v1534_v41 }
 0x240   : > { %v1823_v9 = vadd.f32 %v3694_v15, %v1800_v25 }
 0x242   : > { %v1842_v45 = vmax.f32 %v1823_v9, 0.0 }
 0x244   : > { %v1241_v49 = vpop.f32.mrf.mxu3  ;;  %v1854_v32 = vpack.c.bf16 %v1842_v45, %v1841_v44  ;;  %v1509_v2 = vpop.f32.mrf.mxu0 }
 0x245   : > { %v1269_v51 = vadd.f32 %v1241_v49, %v1003_v27 }
 0x247   : > { %v1535_v5 = vadd.f32 %v1507_v0, %v1269_v51 }
 0x24a   : > { %1964 = vmatmul.bf16.gmra.mxu2 %v1854_v32 }
 0x24c   : > { %v1243_v54 = vpop.f32.mrf.mxu3 }
 0x24d   : > { %v980_v33 = vpop.f32.mrf.mxu2  ;;  %v1270_v28 = vadd.f32 %v1243_v54, %v1004_v60 }
 0x24e   : > { %v1005_v1 = vadd.f32 %v980_v33, %v3608_v19 }
 0x24f   : > { %v1536_v61 = vadd.f32 %v1509_v2, %v1270_v28 }
 0x250   : > { %v1773_v8 = vpop.f32.mrf.mxu1 }
 0x251   : > { %v1801_v40 = vadd.f32 %v1773_v8, %v1535_v5 }
 0x253   : > { %v1824_v13 = vadd.f32 %v3694_v15, %v1801_v40 }
 0x255   : > { %v982_v11 = vpop.f32.mrf.mxu2  ;;  %v1843_v22 = vmax.f32 %v1824_v13, 0.0 }
 0x256   : > { %v1006_v17 = vadd.f32 %v982_v11, %v3615_v23 }
 0x258   : > { %v1775_v18 = vpop.f32.mrf.mxu1 }
 0x259   : > { %v1802_v6 = vadd.f32 %v1775_v18, %v1536_v61 }
 0x25b   : > { %v1825_v52 = vadd.f32 %v3694_v15, %v1802_v6 }
 0x25d   : > { %v1844_v3 = vmax.f32 %v1825_v52, 0.0  ;;  %v985_v21 = vpop.f32.mrf.mxu2 }
 0x25e   : > { %v1007_v39 = vadd.f32 %v985_v21, %v3626_v38 }
 0x25f   : > { %v1246_v53 = vpop.f32.mrf.mxu3  ;;  %v1855_v55 = vpack.c.bf16 %v1844_v3, %v1843_v22 }
 0x260   : > { %v1271_v16 = vadd.f32 %v1246_v53, %v1005_v1 }
 0x261   : > { %1969 = vmatmul.bf16.gmra.mxu2 %v1855_v55 }
 0x262   : > { %v1512_v10 = vpop.f32.mrf.mxu0 }
 0x263   : > { %v1537_v59 = vadd.f32 %v1512_v10, %v1271_v16 }
 0x265   : > { %v987_v35 = vpop.f32.mrf.mxu2 }
 0x267   : > { %v1248_v58 = vpop.f32.mrf.mxu3 }
 0x268   : > { %v1272_v19 = vadd.f32 %v1248_v58, %v1006_v17 }
 0x26a   : > { %v1514_v46 = vpop.f32.mrf.mxu0 }
 0x26b   : > { %v1778_v57 = vpop.f32.mrf.mxu1  ;;  %v1538_v24 = vadd.f32 %v1514_v46, %v1272_v19 }
 0x26c   : > { %v1803_v31 = vadd.f32 %v1778_v57, %v1537_v59 }
 0x26d   : > { %v1935_v4 = vpop.f32.mrf.mxu2 }
 0x26e   : > { %v1936_v26 = vadd.f32 %v3757_v14, %v1935_v4  ;;  %v1826_v23 = vadd.f32 %v3694_v15, %v1803_v31 }
 0x26f   : > { %v1251_v50 = vpop.f32.mrf.mxu3 }
 0x270   : > { %1984 = vst [vmem:[%s3765_s12] sm:$0xff] %v1936_v26  ;;  %v1845_v12 = vmax.f32 %v1826_v23, 0.0  ;;  %v1273_v42 = vadd.f32 %v1251_v50, %v1007_v39 }
 0x273   : > { %v1780_v20 = vpop.f32.mrf.mxu1 }
 0x274   : > { %v1804_v30 = vadd.f32 %v1780_v20, %v1538_v24  ;;  %v1517_v34 = vpop.f32.mrf.mxu0 }
 0x275   : > { %v1937_v56 = vpop.f32.mrf.mxu2  ;;  %v1539_v47 = vadd.f32 %v1517_v34, %v1273_v42 }
 0x276   : > { %v1827_v62 = vadd.f32 %v3694_v15, %v1804_v30  ;;  %v1938_v37 = vadd.f32 %v3757_v14, %v1937_v56 }
 0x277   : > { %v1253_v7 = vpop.f32.mrf.mxu3 }
 0x278   : > { %v1846_v29 = vmax.f32 %v1827_v62, 0.0  ;;  %1985 = vst [vmem:[%s3765_s12 + $0x8] sm:$0xff] %v1938_v37 }
 0x27a   : > { %v1856_v41 = vpack.c.bf16 %v1846_v29, %v1845_v12 }
 0x27b   : > { %v1783_v43 = vpop.f32.mrf.mxu1 }
 0x27c   : > { %1974 = vmatmul.bf16.gmra.mxu2 %v1856_v41  ;;  %v1519_v25 = vpop.f32.mrf.mxu0  ;;  %v1805_v48 = vadd.f32 %v1783_v43, %v1539_v47 }
 0x27d   : > { %v1940_v9 = vpop.f32.mrf.mxu2 }
 0x27e   : > { %v1941_v45 = vadd.f32 %v3757_v14, %v1940_v9  ;;  %v1828_v63 = vadd.f32 %v3694_v15, %v1805_v48 }
 0x280   : > { %1986 = vst [vmem:[%s3765_s12 + $0x10] sm:$0xff] %v1941_v45  ;;  %v1847_v49 = vmax.f32 %v1828_v63, 0.0 }
 0x282   : > { %v1857_v0 = vpack.c.bf16 %v1847_v49, %v1847_v49 }
 0x283   : > { %v1785_v38 = vpop.f32.mrf.mxu1 }
 0x285   : > { %v1942_v44 = vpop.f32.mrf.mxu2 }
 0x286   : > { %v1943_v32 = vadd.f32 %v3757_v14, %v1942_v44 }
 0x288   : > { %1987 = vst [vmem:[%s3765_s12 + $0x18] sm:$0xff] %v1943_v32 }
 0x28c   : > { %1979 = vmatmul.bf16.gmra.mxu2 %v1857_v0 }
 0x28d   : > { %v1945_v27 = vpop.f32.mrf.mxu2 }
 0x28e   : > { %v1946_v33 = vadd.f32 %v3757_v14, %v1945_v27 }
 0x290   : > { %1988 = vst [vmem:[%s3765_s12 + $0x20] sm:$0xff] %v1946_v33 }
 0x295   : > { %v1947_v36 = vpop.f32.mrf.mxu2 }
 0x296   : > { %v1948_v51 = vadd.f32 %v3757_v14, %v1947_v36 }
 0x298   : > { %1989 = vst [vmem:[%s3765_s12 + $0x28] sm:$0xff] %v1948_v51 }
 0x29d   : > { %v1950_v15 = vpop.f32.mrf.mxu2 }
 0x29e   : > { %v1951_v54 = vadd.f32 %v3757_v14, %v1950_v15 }
 0x2a0   : > { %1990 = vst [vmem:[%s3765_s12 + $0x30] sm:$0xff] %v1951_v54 }
 0x2a5   : > { %v1952_v8 = vpop.f32.mrf.mxu2 }
 0x2a6   : > { %v1953_v60 = vadd.f32 %v3757_v14, %v1952_v8 }
 0x2a8   : > { %1991 = vst [vmem:[%s3765_s12 + $0x38] sm:$0xff] %v1953_v60 }
 0x2ad   : > { %v1955_v28 = vpop.f32.mrf.mxu2 }
 0x2ae   : > { %v1956_v5 = vadd.f32 %v3757_v14, %v1955_v28 }
 0x2b0   : > { %1992 = vst [vmem:[%s3765_s12 + $0x40] sm:$0xff] %v1956_v5 }
 0x2b5   : > { %v1957_v40 = vpop.f32.mrf.mxu2 }
 0x2b6   : > { %v1958_v11 = vadd.f32 %v3757_v14, %v1957_v40 }
 0x2b8   : > { %1993 = vst [vmem:[%s3765_s12 + $0x48] sm:$0xff] %v1958_v11 }
 0x2bd   : > { %v1960_v2 = vpop.f32.mrf.mxu2 }
 0x2be   : > { %v1961_v61 = vadd.f32 %v3757_v14, %v1960_v2 }
 0x2c0   : > { %1994 = vst [vmem:[%s3765_s12 + $0x50] sm:$0xff] %v1961_v61 }
 0x2c5   : > { %v1962_v18 = vpop.f32.mrf.mxu2 }
 0x2c6   : > { %v1963_v13 = vadd.f32 %v3757_v14, %v1962_v18 }
 0x2c8   : > { %1995 = vst [vmem:[%s3765_s12 + $0x58] sm:$0xff] %v1963_v13 }
 0x2cd   : > { %v1965_v6 = vpop.f32.mrf.mxu2 }
 0x2ce   : > { %v1966_v52 = vadd.f32 %v3757_v14, %v1965_v6 }
 0x2d0   : > { %1996 = vst [vmem:[%s3765_s12 + $0x60] sm:$0xff] %v1966_v52 }
 0x2d5   : > { %v1967_v22 = vpop.f32.mrf.mxu2 }
 0x2d6   : > { %v1968_v3 = vadd.f32 %v3757_v14, %v1967_v22 }
 0x2d8   : > { %1997 = vst [vmem:[%s3765_s12 + $0x68] sm:$0xff] %v1968_v3 }
 0x2e4   : > { %v1970_v21 = vpop.f32.mrf.mxu2 }
 0x2e5   : > { %v1971_v53 = vadd.f32 %v3757_v14, %v1970_v21 }
 0x2e7   : > { %1998 = vst [vmem:[%s3765_s12 + $0x70] sm:$0xff] %v1971_v53 }
 0x2ec   : > { %v1972_v55 = vpop.f32.mrf.mxu2 }
 0x2ed   : > { %v1973_v10 = vadd.f32 %v3757_v14, %v1972_v55 }
 0x2ef   : > { %1999 = vst [vmem:[%s3765_s12 + $0x78] sm:$0xff] %v1973_v10 }
 0x2ff   : > { %v1975_v35 = vpop.f32.mrf.mxu2 }
 0x300   : > { %v1976_v58 = vadd.f32 %v3757_v14, %v1975_v35 }
 0x302   : > { %2000 = vst [vmem:[%s3765_s12 + $0x80] sm:$0xff] %v1976_v58 }
 0x307   : > { %v1977_v1 = vpop.f32.mrf.mxu2 }
 0x308   : > { %v1978_v16 = vadd.f32 %v3757_v14, %v1977_v1 }
 0x30a   : > { %2001 = vst [vmem:[%s3765_s12 + $0x88] sm:$0xff] %v1978_v16 }
 0x30f   : > { %v1980_v57 = vpop.f32.mrf.mxu2 }
 0x310   : > { %v1981_v17 = vadd.f32 %v3757_v14, %v1980_v57 }
 0x312   : > { %2002 = vst [vmem:[%s3765_s12 + $0x90] sm:$0xff] %v1981_v17 }
 0x317   : > { %v1982_v46 = vpop.f32.mrf.mxu2 }
 0x318 PF: > { %s15_s18 = sadd.s32 1, %s2796_s18  }
 0x319   : > { %p12_p4 = scmp.ge.s32.totalorder %s15_s18, 4  }
 0x31b   :  { %14 = sbr.rel (!%p12_p4) target bundleno = 1 (0x1), region = 75 }

</bundles_post_ra>
